<compile_context>
chip_gen: v7x
topology: tpu7x:2x2x1
jax: 0.10.0
libtpu: 0.0.40
codegen_flags: <defaults>
</compile_context>

<pallas_src>
import functools
import math

import jax
import jax.numpy as jnp
from jax.experimental import pallas as pl
from jax.experimental.pallas import tpu as pltpu

LN_EPS = 1e-5
_INV_SQRT2 = 1.0 / math.sqrt(2.0)


def _gelu_exact(x):
    # PyTorch F.gelu default = exact erf-based GELU.
    return 0.5 * x * (1.0 + jax.lax.erf(x * _INV_SQRT2))


def _round_up(v, m):
    return ((v + m - 1) // m) * m


def fused_gprgnn_kernel(
    temp_ref,    # SMEM (K+1,) f32        GPR coefficients
    x_ref,       # VMEM (TM, F_pad) bf16  node-feature row tile (only valid at k==0)
    w1t_ref,     # VMEM (F_pad, H_pad) bf16  lin1 weight, pre-transposed, zero-padded
    b1_ref,      # VMEM (1, H_pad) f32
    gamma_ref,   # VMEM (1, H_pad) f32    LayerNorm affine (zero-padded lanes)
    beta_ref,    # VMEM (1, H_pad) f32
    w2t_ref,     # VMEM (H_pad, C_pad) bf16  lin2 weight, pre-transposed, zero-padded
    b2_ref,      # VMEM (1, C_pad) f32
    adj_ref,     # VMEM (TM, N_pad) bf16  streamed A_hat row slab (only valid at k>=1)
    out_ref,     # VMEM (TM, C_pad) f32
    xa_ref,      # scratch VMEM (N_pad, C_pad) bf16  ping buffer for x_k
    xb_ref,      # scratch VMEM (N_pad, C_pad) bf16  pong buffer for x_k
    hid_ref,     # scratch VMEM (N_pad, C_pad) f32   GPR accumulator
    *,
    num_hid,
):
    k = pl.program_id(0)          # 0 = MLP, 1..K = propagation step
    i = pl.program_id(1)          # node-row tile index
    tm = out_ref.shape[0]
    row0 = pl.multiple_of(i * tm, tm)

    # ---------------- k == 0 : MLP (lin1 -> gelu -> LN -> lin2) -------------
    @pl.when(k == 0)
    def _mlp():
        x = x_ref[...]
        h = jnp.dot(x, w1t_ref[...], preferred_element_type=jnp.float32) + b1_ref[...]
        h = _gelu_exact(h)

        # LayerNorm over the *real* num_hid lanes only (padded lanes are masked
        # out of the statistics; gamma/beta are zero-padded so padded lanes
        # stay exactly 0 afterwards).
        lane = jax.lax.broadcasted_iota(jnp.int32, h.shape, 1)
        mask = lane < num_hid
        inv_h = 1.0 / float(num_hid)
        mean = jnp.sum(jnp.where(mask, h, 0.0), axis=-1, keepdims=True) * inv_h
        d = jnp.where(mask, h - mean, 0.0)
        var = jnp.sum(d * d, axis=-1, keepdims=True) * inv_h
        hn = d * jax.lax.rsqrt(var + LN_EPS) * gamma_ref[...] + beta_ref[...]

        y = jnp.dot(hn.astype(w2t_ref.dtype), w2t_ref[...],
                    preferred_element_type=jnp.float32) + b2_ref[...]

        # x_0 -> ping buffer (bf16);  hidden = temp[0] * x_0
        xa_ref[pl.ds(row0, tm), :] = y.astype(xa_ref.dtype)
        hid_ref[pl.ds(row0, tm), :] = temp_ref[0] * y

    # ---------------- k >= 1 : one GPR propagation step ----------------------
    @pl.when(k > 0)
    def _prop():
        adj = adj_ref[...]                        # (TM, N_pad) bf16

        def step(src_ref, dst_ref):
            # x_k[tile] = A_hat[tile, :] @ x_{k-1}   (bf16 x bf16 -> f32 acc)
            xk = jnp.dot(adj, src_ref[...], preferred_element_type=jnp.float32)
            dst_ref[pl.ds(row0, tm), :] = xk.astype(dst_ref.dtype)
            hid_ref[pl.ds(row0, tm), :] = hid_ref[pl.ds(row0, tm), :] + temp_ref[k] * xk

        @pl.when((k & 1) == 1)                    # odd k: read ping, write pong
        def _odd():
            step(xa_ref, xb_ref)

        @pl.when((k & 1) == 0)                    # even k: read pong, write ping
        def _even():
            step(xb_ref, xa_ref)

    # ---------------- final k : emit the accumulated GPR output --------------
    @pl.when(k == pl.num_programs(0) - 1)
    def _final():
        out_ref[...] = hid_ref[pl.ds(row0, tm), :].astype(out_ref.dtype)


def gprgnn_forward(x, adj_hat, params, K, *, tm=256):
    # TODO(synk): dropout (p=0.1, training) omitted — forward in eval mode.
    assert tm % 128 == 0, "tm must be a multiple of 128 (lane alignment of A_hat)"
    N, f_in = x.shape
    num_hid = params["w1"].shape[0]
    out_ch = params["w2"].shape[0]

    n_pad = _round_up(N, tm)
    f_pad = _round_up(f_in, 128)
    h_pad = _round_up(num_hid, 128)
    c_pad = _round_up(out_ch, 128)

    # Zero-pad to lane-dense shapes, pre-transpose the Linear weights, and cast
    # the big operands to bf16 (halves their VMEM / HBM footprint).
    x_p = jnp.zeros((n_pad, f_pad), jnp.float32).at[:N, :f_in].set(x).astype(jnp.bfloat16)
    w1t = (jnp.zeros((f_pad, h_pad), jnp.float32)
           .at[:f_in, :num_hid].set(params["w1"].T).astype(jnp.bfloat16))
    b1 = jnp.zeros((1, h_pad), jnp.float32).at[:, :num_hid].set(params["b1"])
    gamma = jnp.zeros((1, h_pad), jnp.float32).at[:, :num_hid].set(params["gamma"])
    beta = jnp.zeros((1, h_pad), jnp.float32).at[:, :num_hid].set(params["beta"])
    w2t = (jnp.zeros((h_pad, c_pad), jnp.float32)
           .at[:num_hid, :out_ch].set(params["w2"].T).astype(jnp.bfloat16))
    b2 = jnp.zeros((1, c_pad), jnp.float32).at[:, :out_ch].set(params["b2"])
    # Padded A_hat columns/rows are zero, so padded nodes never contaminate
    # real rows.  bf16 halves the HBM stream of the bandwidth-bound propagation.
    adj_p = (jnp.zeros((n_pad, n_pad), jnp.float32).at[:N, :N].set(adj_hat)
             ).astype(jnp.bfloat16)
    temp = params["temp"].astype(jnp.float32)

    n_tiles = n_pad // tm
    last_tile = n_tiles - 1
    grid = (K + 1, n_tiles)

    # ---- explicit VMEM budget (review: default scoped limit is far below phys) ----
    scratch_bytes = n_pad * c_pad * (2 + 2 + 4)          # ping + pong (bf16) + acc (f32)
    adj_db = 2 * tm * n_pad * 2                          # double-buffered A_hat slab (bf16)
    x_db = 2 * tm * f_pad * 2                            # double-buffered x tile (bf16)
    w_db = 2 * (f_pad * h_pad + h_pad * c_pad) * 2       # double-buffered bf16 weights
    vec_db = 2 * (3 * h_pad + c_pad) * 4                 # biases / LN affine (f32)
    out_db = 2 * tm * c_pad * 4                          # double-buffered output block
    need = scratch_bytes + adj_db + x_db + w_db + vec_db + out_db
    try:
        phys_vmem = pltpu.get_tpu_info().vmem_capacity_bytes   # 128 MiB v5e/v6e, 64 MiB v7x
    except Exception:
        phys_vmem = 64 << 20                                   # conservative fallback
    vmem_limit = int(min(max(int(need * 1.25) + (2 << 20), 32 << 20),
                         int(phys_vmem * 0.85)))

    kernel = functools.partial(fused_gprgnn_kernel, num_hid=num_hid)

    out_p = pl.pallas_call(
        kernel,
        out_shape=jax.ShapeDtypeStruct((n_pad, c_pad), jnp.float32),
        grid=grid,
        in_specs=[
            pl.BlockSpec(memory_space=pltpu.MemorySpace.SMEM),            # temp (K+1,)
            # x is only consumed at k==0; pin the block for k>=1 so the feature
            # matrix is NOT re-streamed on every propagation step.
            pl.BlockSpec((tm, f_pad),
                         lambda k, i: (jnp.where(k == 0, i, last_tile), 0)),
            pl.BlockSpec((f_pad, h_pad), lambda k, i: (0, 0)),            # w1^T (resident)
            pl.BlockSpec((1, h_pad), lambda k, i: (0, 0)),                # b1
            pl.BlockSpec((1, h_pad), lambda k, i: (0, 0)),                # gamma
            pl.BlockSpec((1, h_pad), lambda k, i: (0, 0)),                # beta
            pl.BlockSpec((h_pad, c_pad), lambda k, i: (0, 0)),            # w2^T (resident)
            pl.BlockSpec((1, c_pad), lambda k, i: (0, 0)),                # b2
            # A_hat is only consumed at k>=1; clamp to block 0 during the MLP
            # phase so the full adjacency is not streamed once for nothing.
            pl.BlockSpec((tm, n_pad),
                         lambda k, i: (jnp.where(k == 0, 0, i), 0)),
        ],
        out_specs=pl.BlockSpec((tm, c_pad), lambda k, i: (i, 0)),
        scratch_shapes=[
            pltpu.VMEM((n_pad, c_pad), jnp.bfloat16),   # x_k ping
            pltpu.VMEM((n_pad, c_pad), jnp.bfloat16),   # x_k pong
            pltpu.VMEM((n_pad, c_pad), jnp.float32),    # GPR accumulator
        ],
        compiler_params=pltpu.CompilerParams(
            # Row-tile axis must stay sequential: k-step i reads the full
            # x_{k-1} written by *all* tiles through shared VMEM scratch.
            dimension_semantics=("arbitrary", "arbitrary"),
            vmem_limit_bytes=vmem_limit,
        ),
    )(temp, x_p, w1t, b1, gamma, beta, w2t, b2, adj_p)

    return out_p[:N, :out_ch]


def build_gcn_adj(edge_index, num_nodes):
    """gcn_norm with self-loops and unit edge weights; returns dense A_hat such
    that propagate(x) == A_hat @ x (row i aggregates messages from sources j)."""
    src = edge_index[0]
    dst = edge_index[1]
    loop = jnp.arange(num_nodes, dtype=src.dtype)
    src = jnp.concatenate([src, loop])
    dst = jnp.concatenate([dst, loop])
    w = jnp.ones(src.shape[0], dtype=jnp.float32)
    deg = jnp.zeros((num_nodes,), jnp.float32).at[dst].add(w)
    dinv = jnp.where(deg > 0, jax.lax.rsqrt(deg), 0.0)
    norm = dinv[src] * w * dinv[dst]
    A = jnp.zeros((num_nodes, num_nodes), jnp.float32).at[dst, src].add(norm)
    return A


def init_params(key, in_channels, num_hid, out_channels, K):
    k1, k2, k3, k4, k5 = jax.random.split(key, 5)
    # PyTorch Linear default init: uniform(-1/sqrt(fan_in), 1/sqrt(fan_in)).
    b1lim = 1.0 / math.sqrt(in_channels)
    b2lim = 1.0 / math.sqrt(num_hid)
    w1 = jax.random.uniform(k1, (num_hid, in_channels), jnp.float32, -b1lim, b1lim)
    b1 = jax.random.uniform(k2, (1, num_hid), jnp.float32, -b1lim, b1lim)
    w2 = jax.random.uniform(k3, (out_channels, num_hid), jnp.float32, -b2lim, b2lim)
    b2 = jax.random.uniform(k4, (1, out_channels), jnp.float32, -b2lim, b2lim)
    gamma = jnp.ones((1, num_hid), jnp.float32)
    beta = jnp.zeros((1, num_hid), jnp.float32)
    # GPR_prop 'Random' init: uniform(-sqrt(3/(K+1)), sqrt(3/(K+1))), L1-normalized.
    bound = math.sqrt(3.0 / (K + 1))
    temp = jax.random.uniform(k5, (K + 1,), jnp.float32, -bound, bound)
    temp = temp / jnp.sum(jnp.abs(temp))
    return dict(w1=w1, b1=b1, w2=w2, b2=b2, gamma=gamma, beta=beta, temp=temp)


def gprgnn_reference(x, adj, params, K):
    """Pure-JAX reference of the eval-mode forward (for a sanity check)."""
    h = x @ params["w1"].T + params["b1"]
    h = _gelu_exact(h)
    mean = h.mean(-1, keepdims=True)
    var = ((h - mean) ** 2).mean(-1, keepdims=True)
    h = (h - mean) / jnp.sqrt(var + LN_EPS) * params["gamma"] + params["beta"]
    y = h @ params["w2"].T + params["b2"]
    hidden = params["temp"][0] * y
    xk = y
    for k in range(K):
        xk = adj @ xk
        hidden = hidden + params["temp"][k + 1] * xk
    return hidden


if __name__ == "__main__":
    # Small shapes consistent with the module: N nodes, node features, hidden, classes.
    N = 200               # deliberately not a tile multiple -> exercises row padding
    in_channels = 32
    num_hid = 16
    out_channels = 8
    K = 2
    E = 800

    key = jax.random.PRNGKey(0)
    kx, ke, kp = jax.random.split(key, 3)

    x = jax.random.normal(kx, (N, in_channels), jnp.float32)
    edge_index = jax.random.randint(ke, (2, E), 0, N, dtype=jnp.int32)

    params = init_params(kp, in_channels, num_hid, out_channels, K)
    adj_hat = build_gcn_adj(edge_index, N)

    # Loose tolerance: bf16 weights / features / A_hat stream vs f32 reference.
    ref = gprgnn_reference(x, adj_hat, params, K)

    # tm=128 exercises the multi-tile + padded-row path; tm=256 is the larger
    # tile recommended for v6e/v7x (fewer grid steps, fuller MXU).
    for tm in (128, 256):
        out = gprgnn_forward(x, adj_hat, params, K, tm=tm)
        jax.block_until_ready(out)
        assert out.shape == (N, out_channels)
        max_err = float(jnp.max(jnp.abs(out - ref)))
        assert jnp.allclose(out, ref, rtol=5e-2, atol=5e-2), (tm, max_err)

    print("KERNEL_OK")
</pallas_src>

<mosaic_0001>
module attributes {stable_mosaic.version = 11 : i64} {
  func.func @fused_gprgnn_kernel(%arg0: i32, %arg1: i32, %arg2: memref<3xf32, #tpu.memory_space<smem>>, %arg3: memref<128x128xbf16, #tpu.memory_space<vmem>>, %arg4: memref<128x128xbf16, #tpu.memory_space<vmem>>, %arg5: memref<1x128xf32, #tpu.memory_space<vmem>>, %arg6: memref<1x128xf32, #tpu.memory_space<vmem>>, %arg7: memref<1x128xf32, #tpu.memory_space<vmem>>, %arg8: memref<128x128xbf16, #tpu.memory_space<vmem>>, %arg9: memref<1x128xf32, #tpu.memory_space<vmem>>, %arg10: memref<128x256xbf16, #tpu.memory_space<vmem>>, %arg11: memref<128x128xf32, #tpu.memory_space<vmem>>, %arg12: memref<256x128xbf16, #tpu.memory_space<vmem>>, %arg13: memref<256x128xbf16, #tpu.memory_space<vmem>>, %arg14: memref<256x128xf32, #tpu.memory_space<vmem>>) attributes {dimension_semantics = [#tpu.dimension_semantics<arbitrary>, #tpu.dimension_semantics<arbitrary>], iteration_bounds = array<i64: 3, 2>, scalar_prefetch = 0 : i64, scratch_operands = 3 : i64, tpu.core_type = #tpu.core_type<tc>, window_params = [{transform_indices = @transform_0, window_bounds = array<i64: 3>}, {transform_indices = @transform_1, window_bounds = array<i64: 128, 128>}, {pipeline_mode = #tpu.pipeline_mode<synchronous>, transform_indices = @transform_2, window_bounds = array<i64: 128, 128>}, {pipeline_mode = #tpu.pipeline_mode<synchronous>, transform_indices = @transform_3, window_bounds = array<i64: 1, 128>}, {pipeline_mode = #tpu.pipeline_mode<synchronous>, transform_indices = @transform_4, window_bounds = array<i64: 1, 128>}, {pipeline_mode = #tpu.pipeline_mode<synchronous>, transform_indices = @transform_5, window_bounds = array<i64: 1, 128>}, {pipeline_mode = #tpu.pipeline_mode<synchronous>, transform_indices = @transform_6, window_bounds = array<i64: 128, 128>}, {pipeline_mode = #tpu.pipeline_mode<synchronous>, transform_indices = @transform_7, window_bounds = array<i64: 1, 128>}, {transform_indices = @transform_8, window_bounds = array<i64: 128, 256>}, {transform_indices = @transform_9, window_bounds = array<i64: 128, 128>}]} {
    %c128_i32 = arith.constant 128 : i32
    %0 = arith.muli %arg1, %c128_i32 : i32
    %1 = tpu.assume_multiple %0, 128 : i32
    %c0_i32 = arith.constant 0 : i32
    %2 = arith.cmpi eq, %arg0, %c0_i32 : i32
    %3 = arith.extui %2 : i1 to i32
    %c0_i32_0 = arith.constant 0 : i32
    %4 = arith.cmpi ne, %3, %c0_i32_0 : i32
    scf.if %4 {
      %c0 = arith.constant 0 : index
      %c0_4 = arith.constant 0 : index
      %11 = vector.load %arg3[%c0, %c0_4] : memref<128x128xbf16, #tpu.memory_space<vmem>>, vector<128x128xbf16>
      %c0_5 = arith.constant 0 : index
      %c0_6 = arith.constant 0 : index
      %12 = vector.load %arg4[%c0_5, %c0_6] : memref<128x128xbf16, #tpu.memory_space<vmem>>, vector<128x128xbf16>
      %cst = arith.constant dense<0.000000e+00> : vector<128x128xf32>
      %13 = tpu.matmul %11, %12, %cst {dimension_numbers = #tpu.dot_dimension_numbers<[1], [0], [0], [1], [0, 0, 1, 1], [], []>} : vector<128x128xbf16>, vector<128x128xbf16>, vector<128x128xf32> -> vector<128x128xf32>
      %c0_7 = arith.constant 0 : index
      %c0_8 = arith.constant 0 : index
      %14 = vector.load %arg5[%c0_7, %c0_8] : memref<1x128xf32, #tpu.memory_space<vmem>>, vector<1x128xf32>
      %15 = vector.broadcast %14 : vector<1x128xf32> to vector<128x128xf32>
      %16 = arith.addf %13, %15 : vector<128x128xf32>
      %cst_9 = arith.constant 5.000000e-01 : f32
      %17 = vector.broadcast %cst_9 : f32 to vector<128x128xf32>
      %18 = arith.mulf %17, %16 : vector<128x128xf32>
      %cst_10 = arith.constant 0.707106769 : f32
      %19 = vector.broadcast %cst_10 : f32 to vector<128x128xf32>
      %20 = arith.mulf %16, %19 : vector<128x128xf32>
      %21 = math.erf %20 : vector<128x128xf32>
      %cst_11 = arith.constant 1.000000e+00 : f32
      %22 = vector.broadcast %cst_11 : f32 to vector<128x128xf32>
      %23 = arith.addf %22, %21 : vector<128x128xf32>
      %24 = arith.mulf %18, %23 : vector<128x128xf32>
      %25 = tpu.iota {dimensions = array<i32: 1>} : vector<128x128xi32>
      %c16_i32 = arith.constant 16 : i32
      %26 = vector.broadcast %c16_i32 : i32 to vector<128x128xi32>
      %27 = arith.cmpi slt, %25, %26 : vector<128x128xi32>
      %cst_12 = arith.constant 0.000000e+00 : f32
      %28 = vector.broadcast %cst_12 : f32 to vector<128x128xf32>
      %29 = arith.select %27, %24, %28 : vector<128x128xi1>, vector<128x128xf32>
      %cst_13 = arith.constant dense<0.000000e+00> : vector<128xf32>
      %30 = vector.multi_reduction <add>, %29, %cst_13 [1] : vector<128x128xf32> to vector<128xf32>
      %31 = vector.shape_cast %30 : vector<128xf32> to vector<128x1xf32>
      %cst_14 = arith.constant 6.250000e-02 : f32
      %32 = vector.broadcast %cst_14 : f32 to vector<128x1xf32>
      %33 = arith.mulf %31, %32 : vector<128x1xf32>
      %34 = vector.broadcast %33 : vector<128x1xf32> to vector<128x128xf32>
      %35 = arith.subf %24, %34 : vector<128x128xf32>
      %cst_15 = arith.constant 0.000000e+00 : f32
      %36 = vector.broadcast %cst_15 : f32 to vector<128x128xf32>
      %37 = arith.select %27, %35, %36 : vector<128x128xi1>, vector<128x128xf32>
      %38 = arith.mulf %37, %37 : vector<128x128xf32>
      %cst_16 = arith.constant dense<0.000000e+00> : vector<128xf32>
      %39 = vector.multi_reduction <add>, %38, %cst_16 [1] : vector<128x128xf32> to vector<128xf32>
      %40 = vector.shape_cast %39 : vector<128xf32> to vector<128x1xf32>
      %cst_17 = arith.constant 6.250000e-02 : f32
      %41 = vector.broadcast %cst_17 : f32 to vector<128x1xf32>
      %42 = arith.mulf %40, %41 : vector<128x1xf32>
      %cst_18 = arith.constant 9.99999974E-6 : f32
      %43 = vector.broadcast %cst_18 : f32 to vector<128x1xf32>
      %44 = arith.addf %42, %43 : vector<128x1xf32>
      %45 = math.rsqrt %44 : vector<128x1xf32>
      %46 = vector.broadcast %45 : vector<128x1xf32> to vector<128x128xf32>
      %47 = arith.mulf %37, %46 : vector<128x128xf32>
      %c0_19 = arith.constant 0 : index
      %c0_20 = arith.constant 0 : index
      %48 = vector.load %arg6[%c0_19, %c0_20] : memref<1x128xf32, #tpu.memory_space<vmem>>, vector<1x128xf32>
      %49 = vector.broadcast %48 : vector<1x128xf32> to vector<128x128xf32>
      %50 = arith.mulf %47, %49 : vector<128x128xf32>
      %c0_21 = arith.constant 0 : index
      %c0_22 = arith.constant 0 : index
      %51 = vector.load %arg7[%c0_21, %c0_22] : memref<1x128xf32, #tpu.memory_space<vmem>>, vector<1x128xf32>
      %52 = vector.broadcast %51 : vector<1x128xf32> to vector<128x128xf32>
      %53 = arith.addf %50, %52 : vector<128x128xf32>
      %54 = arith.truncf %53 : vector<128x128xf32> to vector<128x128xbf16>
      %c0_23 = arith.constant 0 : index
      %c0_24 = arith.constant 0 : index
      %55 = vector.load %arg8[%c0_23, %c0_24] : memref<128x128xbf16, #tpu.memory_space<vmem>>, vector<128x128xbf16>
      %cst_25 = arith.constant dense<0.000000e+00> : vector<128x128xf32>
      %56 = tpu.matmul %54, %55, %cst_25 {dimension_numbers = #tpu.dot_dimension_numbers<[1], [0], [0], [1], [0, 0, 1, 1], [], []>} : vector<128x128xbf16>, vector<128x128xbf16>, vector<128x128xf32> -> vector<128x128xf32>
      %c0_26 = arith.constant 0 : index
      %c0_27 = arith.constant 0 : index
      %57 = vector.load %arg9[%c0_26, %c0_27] : memref<1x128xf32, #tpu.memory_space<vmem>>, vector<1x128xf32>
      %58 = vector.broadcast %57 : vector<1x128xf32> to vector<128x128xf32>
      %59 = arith.addf %56, %58 : vector<128x128xf32>
      %60 = arith.truncf %59 : vector<128x128xf32> to vector<128x128xbf16>
      %61 = arith.index_cast %1 : i32 to index
      %c0_28 = arith.constant 0 : index
      %62 = vector.load %arg12[%61, %c0_28] : memref<256x128xbf16, #tpu.memory_space<vmem>>, vector<128x128xbf16>
      tpu.vector_store %arg12[%61, %c0_28], %60 {strides = array<i32>} : memref<256x128xbf16, #tpu.memory_space<vmem>>, vector<128x128xbf16>,
      %c0_29 = arith.constant 0 : index
      %63 = memref.load %arg2[%c0_29] : memref<3xf32, #tpu.memory_space<smem>>
      %64 = vector.broadcast %63 : f32 to vector<128x128xf32>
      %65 = arith.mulf %64, %59 : vector<128x128xf32>
      %66 = arith.index_cast %1 : i32 to index
      %c0_30 = arith.constant 0 : index
      %67 = vector.load %arg14[%66, %c0_30] : memref<256x128xf32, #tpu.memory_space<vmem>>, vector<128x128xf32>
      tpu.vector_store %arg14[%66, %c0_30], %65 {strides = array<i32>} : memref<256x128xf32, #tpu.memory_space<vmem>>, vector<128x128xf32>,
    } else {
    }
    %c0_i32_1 = arith.constant 0 : i32
    %5 = arith.cmpi sgt, %arg0, %c0_i32_1 : i32
    %6 = arith.extui %5 : i1 to i32
    %c0_i32_2 = arith.constant 0 : i32
    %7 = arith.cmpi ne, %6, %c0_i32_2 : i32
    scf.if %7 {
      %c0 = arith.constant 0 : index
      %c0_4 = arith.constant 0 : index
      %11 = vector.load %arg10[%c0, %c0_4] : memref<128x256xbf16, #tpu.memory_space<vmem>>, vector<128x256xbf16>
      %c1_i32 = arith.constant 1 : i32
      %12 = arith.andi %arg0, %c1_i32 : i32
      %c1_i32_5 = arith.constant 1 : i32
      %13 = arith.cmpi eq, %12, %c1_i32_5 : i32
      %14 = arith.extui %13 : i1 to i32
      %c0_i32_6 = arith.constant 0 : i32
      %15 = arith.cmpi ne, %14, %c0_i32_6 : i32
      scf.if %15 {
        %c0_10 = arith.constant 0 : index
        %c0_11 = arith.constant 0 : index
        %20 = vector.load %arg12[%c0_10, %c0_11] : memref<256x128xbf16, #tpu.memory_space<vmem>>, vector<256x128xbf16>
        %cst = arith.constant dense<0.000000e+00> : vector<128x128xf32>
        %21 = tpu.matmul %11, %20, %cst {dimension_numbers = #tpu.dot_dimension_numbers<[1], [0], [0], [1], [0, 0, 1, 1], [], []>} : vector<128x256xbf16>, vector<256x128xbf16>, vector<128x128xf32> -> vector<128x128xf32>
        %22 = arith.truncf %21 : vector<128x128xf32> to vector<128x128xbf16>
        %23 = arith.index_cast %1 : i32 to index
        %c0_12 = arith.constant 0 : index
        %24 = vector.load %arg13[%23, %c0_12] : memref<256x128xbf16, #tpu.memory_space<vmem>>, vector<128x128xbf16>
        tpu.vector_store %arg13[%23, %c0_12], %22 {strides = array<i32>} : memref<256x128xbf16, #tpu.memory_space<vmem>>, vector<128x128xbf16>,
        %25 = arith.index_cast %1 : i32 to index
        %c0_13 = arith.constant 0 : index
        %26 = vector.load %arg14[%25, %c0_13] : memref<256x128xf32, #tpu.memory_space<vmem>>, vector<128x128xf32>
        %27 = arith.index_cast %arg0 : i32 to index
        %28 = memref.load %arg2[%27] : memref<3xf32, #tpu.memory_space<smem>>
        %29 = vector.broadcast %28 : f32 to vector<128x128xf32>
        %30 = arith.mulf %29, %21 : vector<128x128xf32>
        %31 = arith.addf %26, %30 : vector<128x128xf32>
        %32 = arith.index_cast %1 : i32 to index
        %c0_14 = arith.constant 0 : index
        %33 = vector.load %arg14[%32, %c0_14] : memref<256x128xf32, #tpu.memory_space<vmem>>, vector<128x128xf32>
        tpu.vector_store %arg14[%32, %c0_14], %31 {strides = array<i32>} : memref<256x128xf32, #tpu.memory_space<vmem>>, vector<128x128xf32>,
      } else {
      }
      %c1_i32_7 = arith.constant 1 : i32
      %16 = arith.andi %arg0, %c1_i32_7 : i32
      %c0_i32_8 = arith.constant 0 : i32
      %17 = arith.cmpi eq, %16, %c0_i32_8 : i32
      %18 = arith.extui %17 : i1 to i32
      %c0_i32_9 = arith.constant 0 : i32
      %19 = arith.cmpi ne, %18, %c0_i32_9 : i32
      scf.if %19 {
        %c0_10 = arith.constant 0 : index
        %c0_11 = arith.constant 0 : index
        %20 = vector.load %arg13[%c0_10, %c0_11] : memref<256x128xbf16, #tpu.memory_space<vmem>>, vector<256x128xbf16>
        %cst = arith.constant dense<0.000000e+00> : vector<128x128xf32>
        %21 = tpu.matmul %11, %20, %cst {dimension_numbers = #tpu.dot_dimension_numbers<[1], [0], [0], [1], [0, 0, 1, 1], [], []>} : vector<128x256xbf16>, vector<256x128xbf16>, vector<128x128xf32> -> vector<128x128xf32>
        %22 = arith.truncf %21 : vector<128x128xf32> to vector<128x128xbf16>
        %23 = arith.index_cast %1 : i32 to index
        %c0_12 = arith.constant 0 : index
        %24 = vector.load %arg12[%23, %c0_12] : memref<256x128xbf16, #tpu.memory_space<vmem>>, vector<128x128xbf16>
        tpu.vector_store %arg12[%23, %c0_12], %22 {strides = array<i32>} : memref<256x128xbf16, #tpu.memory_space<vmem>>, vector<128x128xbf16>,
        %25 = arith.index_cast %1 : i32 to index
        %c0_13 = arith.constant 0 : index
        %26 = vector.load %arg14[%25, %c0_13] : memref<256x128xf32, #tpu.memory_space<vmem>>, vector<128x128xf32>
        %27 = arith.index_cast %arg0 : i32 to index
        %28 = memref.load %arg2[%27] : memref<3xf32, #tpu.memory_space<smem>>
        %29 = vector.broadcast %28 : f32 to vector<128x128xf32>
        %30 = arith.mulf %29, %21 : vector<128x128xf32>
        %31 = arith.addf %26, %30 : vector<128x128xf32>
        %32 = arith.index_cast %1 : i32 to index
        %c0_14 = arith.constant 0 : index
        %33 = vector.load %arg14[%32, %c0_14] : memref<256x128xf32, #tpu.memory_space<vmem>>, vector<128x128xf32>
        tpu.vector_store %arg14[%32, %c0_14], %31 {strides = array<i32>} : memref<256x128xf32, #tpu.memory_space<vmem>>, vector<128x128xf32>,
      } else {
      }
    } else {
    }
    %c2_i32 = arith.constant 2 : i32
    %8 = arith.cmpi eq, %arg0, %c2_i32 : i32
    %9 = arith.extui %8 : i1 to i32
    %c0_i32_3 = arith.constant 0 : i32
    %10 = arith.cmpi ne, %9, %c0_i32_3 : i32
    scf.if %10 {
      %11 = arith.index_cast %1 : i32 to index
      %c0 = arith.constant 0 : index
      %12 = vector.load %arg14[%11, %c0] : memref<256x128xf32, #tpu.memory_space<vmem>>, vector<128x128xf32>
      %c0_4 = arith.constant 0 : index
      %c0_5 = arith.constant 0 : index
      %13 = vector.load %arg11[%c0_4, %c0_5] : memref<128x128xf32, #tpu.memory_space<vmem>>, vector<128x128xf32>
      tpu.vector_store %arg11[%c0_4, %c0_5], %12 {strides = array<i32>} : memref<128x128xf32, #tpu.memory_space<vmem>>, vector<128x128xf32>,
    } else {
    }
    return
  }
  func.func @transform_0(%arg0: i32, %arg1: i32) -> i32 {
    %c0_i32 = arith.constant 0 : i32
    %c0_i32_0 = arith.constant 0 : i32
    return %c0_i32 : i32
  }
  func.func @transform_1(%arg0: i32, %arg1: i32) -> (i32, i32) {
    %c0_i32 = arith.constant 0 : i32
    %0 = arith.cmpi eq, %arg0, %c0_i32 : i32
    %c1_i32 = arith.constant 1 : i32
    %1 = arith.select %0, %arg1, %c1_i32 : i32
    %c0_i32_0 = arith.constant 0 : i32
    %c0_i32_1 = arith.constant 0 : i32
    return %1, %c0_i32_0 : i32, i32
  }
  func.func @transform_2(%arg0: i32, %arg1: i32) -> (i32, i32) {
    %c0_i32 = arith.constant 0 : i32
    %c0_i32_0 = arith.constant 0 : i32
    %c0_i32_1 = arith.constant 0 : i32
    return %c0_i32, %c0_i32_0 : i32, i32
  }
  func.func @transform_3(%arg0: i32, %arg1: i32) -> (i32, i32) {
    %c0_i32 = arith.constant 0 : i32
    %c0_i32_0 = arith.constant 0 : i32
    %c0_i32_1 = arith.constant 0 : i32
    return %c0_i32, %c0_i32_0 : i32, i32
  }
  func.func @transform_4(%arg0: i32, %arg1: i32) -> (i32, i32) {
    %c0_i32 = arith.constant 0 : i32
    %c0_i32_0 = arith.constant 0 : i32
    %c0_i32_1 = arith.constant 0 : i32
    return %c0_i32, %c0_i32_0 : i32, i32
  }
  func.func @transform_5(%arg0: i32, %arg1: i32) -> (i32, i32) {
    %c0_i32 = arith.constant 0 : i32
    %c0_i32_0 = arith.constant 0 : i32
    %c0_i32_1 = arith.constant 0 : i32
    return %c0_i32, %c0_i32_0 : i32, i32
  }
  func.func @transform_6(%arg0: i32, %arg1: i32) -> (i32, i32) {
    %c0_i32 = arith.constant 0 : i32
    %c0_i32_0 = arith.constant 0 : i32
    %c0_i32_1 = arith.constant 0 : i32
    return %c0_i32, %c0_i32_0 : i32, i32
  }
  func.func @transform_7(%arg0: i32, %arg1: i32) -> (i32, i32) {
    %c0_i32 = arith.constant 0 : i32
    %c0_i32_0 = arith.constant 0 : i32
    %c0_i32_1 = arith.constant 0 : i32
    return %c0_i32, %c0_i32_0 : i32, i32
  }
  func.func @transform_8(%arg0: i32, %arg1: i32) -> (i32, i32) {
    %c0_i32 = arith.constant 0 : i32
    %0 = arith.cmpi eq, %arg0, %c0_i32 : i32
    %c0_i32_0 = arith.constant 0 : i32
    %1 = arith.select %0, %c0_i32_0, %arg1 : i32
    %c0_i32_1 = arith.constant 0 : i32
    %c0_i32_2 = arith.constant 0 : i32
    return %1, %c0_i32_1 : i32, i32
  }
  func.func @transform_9(%arg0: i32, %arg1: i32) -> (i32, i32) {
    %c0_i32 = arith.constant 0 : i32
    %c0_i32_0 = arith.constant 0 : i32
    return %arg1, %c0_i32 : i32, i32
  }
}

</mosaic_0001>

<bundles_post_ra>
// kernel: tpu_custom_call.1
= control target key start
LH: loop header
LB: loop body
LE: loop exit
PB: predicated region body
PF: predicated region fallthrough
CT: control target
= control target key end

     0   :  { %s4127_s0 = inlined_call_operand.hbm [shape: f32[3], index: 0, kind: input, shape index: {}]   ;;  %s4128_s1 = inlined_call_operand.hbm [shape: bf16[256,128], index: 1, kind: input, shape index: {}]   ;;  %s4129_s2 = inlined_call_operand.hbm [shape: bf16[128,128], index: 2, kind: input, shape index: {}]   ;;  %s4130_s3 = inlined_call_operand.vmem [shape: f32[1,128], index: 3, kind: input, shape index: {}]   ;;  %s4131_s4 = inlined_call_operand.vmem [shape: f32[1,128], index: 4, kind: input, shape index: {}]   ;;  %s4132_s5 = inlined_call_operand.vmem [shape: f32[1,128], index: 5, kind: input, shape index: {}]   ;;  %s4133_s6 = inlined_call_operand.hbm [shape: bf16[128,128], index: 6, kind: input, shape index: {}]   ;;  %s4134_s7 = inlined_call_operand.vmem [shape: f32[1,128], index: 7, kind: input, shape index: {}]   ;;  %s4135_s8 = inlined_call_operand.hbm [shape: bf16[256,256], index: 8, kind: input, shape index: {}]   ;;  %s4136_s9 = inlined_call_operand.hbm [shape: f32[256,128], index: 9, kind: output, shape index: {}]  }
   0x1   :  { %4159 = sst [smem:[#allocation29_spill]] %s4127_s0 }
   0x2   :  { %4160 = sst [smem:[#allocation30_spill]] %s4129_s2 }
   0x3   :  { %4161 = sst [smem:[#allocation31_spill]] %s4130_s3 }
   0x4   :  { %4162 = sst [smem:[#allocation32_spill]] %s4131_s4 }
   0x5   :  { %4163 = sst [smem:[#allocation33_spill]] %s4132_s5 }
   0x6   :  { %4164 = sst [smem:[#allocation34_spill]] %s4133_s6 }
   0x7   :  { %4165 = sst [smem:[#allocation35_spill]] %s4134_s7 }
   0x8   :  { %4166 = sst [smem:[#allocation36_spill]] %s4136_s9 }
   0x9   :  { %14 = vsyncpa [#allocation8], 0 }
   0xa   :  { %15 = vsyncpa [#allocation6], 0 }
   0xb   :  { %17 = vsyncpa [#allocation6 + $0x1], 0 }
   0xc   :  { %18 = vsyncpa [#allocation11], 0 }
   0xd   :  { %19 = vsyncpa [#allocation14], 0 }
   0xe   :  { %21 = vsyncpa [#allocation14 + $0x1], 0 }
   0xf   :  { %22 = vsyncpa [#allocation7], 0 }
  0x10   :  { %24 = vsyncpa [#allocation7 + $0x1], 0  ;;  %s3024_s30 = smov 0   ;;  %s3026_s10 = smov 0  }
  0x11   :  { %s3028_s11 = smov 0   ;;  %s3030_s12 = smov 0  }
  0x12   :  { %s3032_s13 = smov 0   ;;  %s3034_s14 = smov 0  }
  0x13   :  { %s3036_s15 = smov 0   ;;  %s3038_s16 = smov 0  }
  0x14   :  { %s3040_s17 = smov 0   ;;  %s3042_s18 = smov 0  }
  0x15   :  { %s3044_s19 = smov 0   ;;  %s3046_s20 = smov 0  }
  0x16   :  { %s3048_s21 = smov 0   ;;  %s3050_s22 = smov 0  }
  0x17 LB: > { %4167 = sst [smem:[#allocation21_spill]] %s2908_s30  ;;  %s2062_s23 = sadd.s32 4294967295, %s2960_s22   ;;  %s2960_s22 = sphi %s3050_s22, %s30_s22   ;;  %s2956_s21 = sphi %s3048_s21, %s4236_s21   ;;  %s2952_s20 = sphi %s3046_s20, %s4235_s20   ;;  %s2948_s19 = sphi %s3044_s19, %s4234_s19   ;;  %s2944_s18 = sphi %s3042_s18, %s4233_s18   ;;  %s2940_s17 = sphi %s3040_s17, %s4232_s17   ;;  %s2936_s16 = sphi %s3038_s16, %s4231_s16   ;;  %s2932_s15 = sphi %s3036_s15, %s4230_s15   ;;  %s2928_s14 = sphi %s3034_s14, %s4229_s14   ;;  %s2924_s13 = sphi %s3032_s13, %s4228_s13   ;;  %s2920_s12 = sphi %s3030_s12, %s4227_s12   ;;  %s2916_s11 = sphi %s3028_s11, %s4226_s11   ;;  %s2912_s10 = sphi %s3026_s10, %s4225_s10   ;;  %s2908_s30 = sphi %s3024_s30, %s4223_s30  }
  0x18   : > { %4168 = sst [smem:[#allocation22_spill]] %s2912_s10  ;;  %s2063_s24 = sadd.s32 4294967294, %s2960_s22  }
  0x19   : > { %4169 = sst [smem:[#allocation23_spill]] %s2944_s18  ;;  %p87_p0 = scmp.ne.s32.totalorder %s2936_s16, %s2932_s15 }
  0x1a   : > { %4170 = sst [smem:[#allocation24_spill]] %s2948_s19  ;;  %p3093_p1 = scmp.eq.s32.totalorder %s2062_s23, 0 }
  0x1b   : > { %p243_p2 = scmp.ne.s32.totalorder %s2924_s13, %s2920_s12  ;;  %p266_p4 = scmp.ne.s32.totalorder %s2916_s11, %s2912_s10 }
  0x1c   : > { %s4171_s25 = scalar_select %p3093_p1, 1, 0 }
  0x1d   : > { %p3101_p3 = por %p3093_p1, %p87_p0  ;;  %p3109_p5 = por %p243_p2, %p3093_p1 }
  0x1e   : > { %p267_p6 = scmp.eq.s32.totalorder %s2062_s23, 5  ;;  %p272_p7 = scmp.ne.s32.totalorder %s2912_s10, %s2908_s30 }
  0x1f   : > { %s4172_s27 = scalar_select %p3101_p3, 1, 0 }
  0x20   : > { %s4173_s28 = scalar_select %p3109_p5, 1, 0 }
  0x21   : > { %p273_p8 = scmp.eq.s32.totalorder %s2063_s24, 5  ;;  %p3115_p9 = por %p267_p6, %p266_p4 }
  0x22   : > { %4174 = sst [smem:[#allocation25_spill]] %s4173_s28  ;;  %p2064_p10 = scmp.ge.s32.totalorder %s2960_s22, 1 }
  0x23   : > { %s4175_s29 = scalar_select %p3115_p9, 1, 0 }
  0x24   : > { %p3120_p11 = por %p273_p8, %p272_p7  ;;  %p280_p12 = scmp.lt.s32.totalorder %s2960_s22, 7 }
  0x25   : > { %4176 = sst [smem:[#allocation26_spill]] %s4175_s29  ;;  %s2962_s26 = smov [#allocation10]  }
  0x26   : > { %s4177_s12 = scalar_select %p3120_p11, 1, 0 }
  0x27   : > { %p3125_p13 = pnand %p2064_p10, %p280_p12  ;;  %s301_s9 = sshll.u32 %s2962_s26, 4  ;;  %s302_s9 = int_to_ptr.vmem [resolvable:$true] %s301_s9 }
  0x28   : > { %4178 = sst [smem:[#allocation27_spill]] %s4177_s12  ;;  %s4181_s2 = sld [smem:[#allocation30_spill]] }
  0x29   : > { %s4179_s15 = scalar_select %p3125_p13, 1, 0 }
  0x2a   : > { %p2435_p0 = pneg %p3125_p13 }
  0x2c   : > { %p3133_p2 = pnand %p2435_p0, %p3093_p1 }
  0x2e   : > { %s2673_s12 = scalar_lea.hbm %s4181_s2, 1024  ;;  %p3145_p6 = pneg %p3133_p2 }
  0x2f   : > { %p2674_p4 = scmp.ne.s32.totalorder %s4181_s2, %s2673_s12  ;;  %p2680_p10 = scmp.lt.u32.totalorder %s2673_s12, %s4181_s2 }
  0x31   : > { %p2676_p7 = pnand %p3145_p6, %p2674_p4 }
  0x33   : > { %p2677_p8 = pneg %p2676_p7 }
  0x35   : > { %p2682_p12 = pnand %p2680_p10, %p2677_p8 }
  0x37   : > { %2685 = shalt.err (!%p2682_p12)
}
  0x38   : > { %s2686_s30 = scalar_lea.vmem %s302_s9, 1024  ;;  %p2694_p5 = scmp.lt.s32.totalorder %s302_s9, %s302_s9 }
  0x39   : > { %p2687_p0 = scmp.ne.s32.totalorder %s302_s9, %s2686_s30  ;;  %p2695_p3 = scmp.lt.s32.totalorder %s2686_s30, %s2686_s30 }
  0x3b   : > { %p2689_p11 = pnand %p2687_p0, %p3145_p6  ;;  %p2696_p1 = por %p2695_p3, %p2694_p5 }
  0x3d   : > { %p2690_p9 = pneg %p2689_p11 }
  0x3f   : > { %p2697_p13 = pnand %p2696_p1, %p2690_p9 }
  0x41   : > { %2700 = shalt.err (!%p2697_p13)
}
  0x42   : > { %s4153_s7 = smov 64   ;;  %s4155_s29 = smov 4  }
  0x43   : > { %2441 = dma.hbm_to_vmem [thread:$0]  (!%p3133_p2), %s4181_s2, 1024, %s302_s9, [#allocation11], %s4153_s7, %s4153_s7, %s4155_s29  }
  0x44   : > { %s4183_s0 = sld [smem:[#allocation29_spill]] }
  0x4a   : > { %s2701_s3 = scalar_lea.hbm %s4183_s0, 16 }
  0x4b   : > { %p2702_p1 = scmp.ne.s32.totalorder %s4183_s0, %s2701_s3  ;;  %p2708_p9 = scmp.lt.u32.totalorder %s2701_s3, %s4183_s0 }
  0x4d   : > { %p2704_p3 = pnand %p2702_p1, %p3145_p6 }
  0x4f   : > { %p2705_p5 = pneg %p2704_p3 }
  0x51   : > { %p2710_p11 = pnand %p2708_p9, %p2705_p5 }
  0x53   : > { %2713 = shalt.err (!%p2710_p11)
}
  0x54   : > { %s2965_s28 = smov [#allocation5]   ;;  %s2966_s5 = smov [#allocation12]  }
  0x55   : > { %2438 = dma.hbm_to_smem (!%p3133_p2), %s4183_s0, 16, %s2965_s28, [#allocation8]  }
  0x56   : > { %s323_s19 = sshll.u32 %s2966_s5, 4  ;;  %s4184_s6 = sld [smem:[#allocation34_spill]]  ;;  %s324_s19 = int_to_ptr.vmem [resolvable:$true] %s323_s19 }
  0x5c   : > { %s2714_s30 = scalar_lea.hbm %s4184_s6, 1024 }
  0x5d   : > { %p2715_p13 = scmp.ne.s32.totalorder %s4184_s6, %s2714_s30  ;;  %p2721_p8 = scmp.lt.u32.totalorder %s2714_s30, %s4184_s6 }
  0x5f   : > { %p2717_p4 = pnand %p2715_p13, %p3145_p6 }
  0x61   : > { %p2718_p7 = pneg %p2717_p4 }
  0x63   : > { %p2723_p10 = pnand %p2721_p8, %p2718_p7 }
  0x65   : > { %2726 = shalt.err (!%p2723_p10)
}
  0x66   : > { %s2727_s28 = scalar_lea.vmem %s324_s19, 1024  ;;  %p2735_p3 = scmp.lt.s32.totalorder %s324_s19, %s324_s19 }
  0x67   : > { %p2728_p12 = scmp.ne.s32.totalorder %s324_s19, %s2727_s28  ;;  %p2736_p5 = scmp.lt.s32.totalorder %s2727_s28, %s2727_s28 }
  0x69   : > { %p2730_p0 = pnand %p2728_p12, %p3145_p6  ;;  %p2737_p9 = por %p2736_p5, %p2735_p3 }
  0x6b   : > { %p2731_p1 = pneg %p2730_p0 }
  0x6d   : > { %p2738_p11 = pnand %p2737_p9, %p2731_p1 }
  0x6f   : > { %2741 = shalt.err (!%p2738_p11)
}
  0x70   : > { %s4185_s7 = smov 64   ;;  %s39_s23 = sadd.s32 1, %s2952_s20 }
  0x71   : > { %2444 = dma.hbm_to_vmem [thread:$0]  (!%p3133_p2), %s4184_s6, 1024, %s324_s19, [#allocation11], %s4185_s7, %s4185_s7, %s4155_s29  }
  0x72   : > { %p40_p6 = scmp.ge.s32.totalorder %s39_s23, 2  ;;  %s42_s26 = sadd.s32 1, %s2956_s21 }
  0x73   : > { %p67_p13 = scmp.eq.s32.totalorder %s2956_s21, 0  ;;  %s74_s5 = sadd.s32 1, %s2940_s17 }
  0x74   : > { %s4238_s23 = smov (%p40_p6, %s39_s23), 0  ;;  %s4240_s26 = smov (!%p40_p6, %s42_s26), %s2956_s21 }
  0x75   : > { %s68_s12 = scalar_select %p67_p13, %s2952_s20, 1 }
  0x76   : > { %p44_p4 = scmp.ge.s32.totalorder %s4240_s26, 3  ;;  %p81_p7 = scmp.ne.s32.totalorder %s2940_s17, %s2936_s16 }
  0x77   : > { %p4157_p2 = scmp.eq.s32.totalorder %s2960_s22, 0  ;;  %s253_s19 = ssub.s32 %s2952_s20, %s4238_s23 }
  0x78   : > { %s4242_s26 = smov (%p44_p4, %s4240_s26), 0  ;;  %p254_p10 = scmp.eq.s32.totalorder %s253_s19, 0 }
  0x79   : > { %p3220_p8 = por %p4157_p2, %p81_p7  ;;  %p4158_p12 = scmp.eq.s32.totalorder %s4242_s26, 0 }
  0x7a   : > { %p4156_p0 = scmp.lt.s32.totalorder %s2960_s22, 6  ;;  %s4187_s30 = sadd.s32 1, %s2916_s11 }
  0x7b   : > { %s3229_s10 = scalar_select %p254_p10, %s2916_s11, %s4187_s30  }
  0x7c   : > { %s70_s3 = scalar_select %p4158_p12, %s4238_s23, 1 }
  0x7d   : > { %4188 = sst [smem:[#allocation28_spill]] %s3229_s10  ;;  %s340_s18 = sand.u32 1, %s2940_s17  }
  0x7e   : > { %s2157_s28 = sshll.u32 %s68_s12, 10  ;;  %s71_s9 = ssub.s32 %s68_s12, %s70_s3 }
  0x7f   : > { %p72_p1 = scmp.eq.s32.totalorder %s71_s9, 0  ;;  %s2069_s4 = sshll.u32 %s340_s18, 6 }
  0x80   : > { %s3238_s2 = scalar_lea.hbm %s4128_s1, %s2157_s28  ;;  %s344_s30 = scalar_lea.vmem [#allocation9], %s2069_s4 }
  0x81   : > { %s3241_s19 = scalar_select %p72_p1, %s2940_s17, %s74_s5  }
  0x82   : > { %s353_s6 = sshll.u32 %s344_s30, 4  ;;  %p3247_p3 = pnand %p4156_p0, %p3220_p8  ;;  %s3251_s6 = int_to_ptr.vmem [resolvable:$true] %s353_s6 }
  0x83   : > { %s3253_s0 = scalar_lea.sflag [#allocation6], %s340_s18  ;;  %s2742_s29 = scalar_lea.hbm %s3238_s2, 1024 }
  0x84   : > { %p2743_p5 = scmp.ne.s32.totalorder %s3238_s2, %s2742_s29  ;;  %p2744_p9 = pneg %p3247_p3 }
  0x85   : > { %s2747_s24 = scalar_lea.hbm %s4128_s1, 2048  ;;  %p2748_p4 = scmp.lt.u32.totalorder %s3238_s2, %s4128_s1 }
  0x86   : > { %p2745_p11 = pnand %p2744_p9, %p2743_p5  ;;  %p2749_p7 = scmp.lt.u32.totalorder %s2747_s24, %s2742_s29 }
  0x87   : > { %p2751_p10 = scmp.lt.u32.totalorder %s2742_s29, %s3238_s2 }
  0x88   : > { %p2746_p6 = pneg %p2745_p11  ;;  %p2750_p8 = por %p2749_p7, %p2748_p4 }
  0x8a   : > { %p2752_p1 = por %p2751_p10, %p2750_p8 }
  0x8c   : > { %p2753_p0 = pnand %p2752_p1, %p2746_p6 }
  0x8e   : > { %2756 = shalt.err (!%p2753_p0)
}
  0x8f   : > { %s2757_s18 = scalar_lea.vmem %s3251_s6, 1024  ;;  %s2967_s9 = smov [#allocation9]  }
  0x90   : > { %p2758_p5 = scmp.ne.s32.totalorder %s3251_s6, %s2757_s18  ;;  %s2762_s4 = sshll.u32 %s2967_s9, 4  ;;  %s2763_s4 = int_to_ptr.vmem [resolvable:$false] %s2762_s4 }
  0x91   : > { %s2764_s30 = scalar_lea.vmem %s2763_s4, 2048  ;;  %p2765_p12 = scmp.lt.s32.totalorder %s3251_s6, %s2763_s4 }
  0x92   : > { %p2760_p11 = pnand %p2758_p5, %p2744_p9  ;;  %p2766_p4 = scmp.lt.s32.totalorder %s2764_s30, %s2757_s18 }
  0x94   : > { %p2761_p2 = pneg %p2760_p11  ;;  %p2767_p7 = por %p2766_p4, %p2765_p12 }
  0x96   : > { %p2768_p8 = pnand %p2767_p7, %p2761_p2 }
  0x98   : > { %2771 = shalt.err (!%p2768_p8)
}
  0x99   : > { %s4190_s29 = smov 4   ;;  %p4191_p2 = scmp.eq.s32.totalorder %s4242_s26, 0 }
  0x9a   : > { %2448 = dma.hbm_to_vmem [thread:$0]  (!%p3247_p3), %s3238_s2, 1024, %s3251_s6, %s3253_s0, %s4185_s7, %s4185_s7, %s4190_s29  }
  0x9b   : > { %s224_s10 = scalar_select %p67_p13, 0, %s2952_s20 }
  0x9c   : > { %s226_s5 = scalar_select %p4191_p2, 0, %s4238_s23 }
  0x9d   : > { %s230_s12 = sadd.s32 1, %s2928_s14  ;;  %p237_p12 = scmp.ne.s32.totalorder %s2928_s14, %s2924_s13 }
  0x9e   : > { %s227_s24 = ssub.s32 %s224_s10, %s226_s5  ;;  %s363_s3 = sand.u32 1, %s2928_s14  }
  0x9f   : > { %p228_p0 = scmp.eq.s32.totalorder %s227_s24, 0  ;;  %p4192_p9 = scmp.eq.s32.totalorder %s2960_s22, 0 }
  0xa0   : > { %s2072_s28 = sshll.u32 %s363_s3, 7  ;;  %s2159_s9 = sshll.u32 %s224_s10, 11 }
  0xa1   : > { %p239_p6 = por %p237_p12, %p4192_p9  ;;  %s3302_s2 = scalar_lea.hbm %s4135_s8, %s2159_s9 }
  0xa2   : > { %s3297_s18 = scalar_select %p228_p0, %s2928_s14, %s230_s12  }
  0xa3   : > { %s367_s6 = scalar_lea.vmem [#allocation13], %s2072_s28  ;;  %p4193_p13 = scmp.lt.s32.totalorder %s2960_s22, 6 }
  0xa4   : > { %s377_s7 = sshll.u32 %s367_s6, 4  ;;  %s3312_s29 = scalar_lea.sflag [#allocation14], %s363_s3  ;;  %s3304_s7 = int_to_ptr.vmem [resolvable:$true] %s377_s7 }
  0xa5   : > { %p3308_p3 = pnand %p4193_p13, %p239_p6  ;;  %s2772_s10 = scalar_lea.hbm %s3302_s2, 2048 }
  0xa6   : > { %p2773_p10 = scmp.ne.s32.totalorder %s3302_s2, %s2772_s10  ;;  %s2777_s24 = scalar_lea.hbm %s4135_s8, 4096 }
  0xa7   : > { %p2774_p1 = pneg %p3308_p3  ;;  %p2778_p4 = scmp.lt.u32.totalorder %s3302_s2, %s4135_s8 }
  0xa8   : > { %p2779_p7 = scmp.lt.u32.totalorder %s2777_s24, %s2772_s10  ;;  %p2781_p2 = scmp.lt.u32.totalorder %s2772_s10, %s3302_s2 }
  0xa9   : > { %p2775_p5 = pnand %p2774_p1, %p2773_p10 }
  0xaa   : > { %p2780_p8 = por %p2779_p7, %p2778_p4 }
  0xab   : > { %p2776_p11 = pneg %p2775_p5 }
  0xac   : > { %p2782_p12 = por %p2781_p2, %p2780_p8 }
  0xae   : > { %p2783_p0 = pnand %p2782_p12, %p2776_p11 }
  0xb0   : > { %2786 = shalt.err (!%p2783_p0)
}
  0xb1   : > { %s2787_s3 = scalar_lea.vmem %s3304_s7, 2048  ;;  %s2968_s4 = smov [#allocation13]  }
  0xb2   : > { %p2788_p9 = scmp.ne.s32.totalorder %s3304_s7, %s2787_s3  ;;  %s2792_s30 = sshll.u32 %s2968_s4, 4  ;;  %s2793_s30 = int_to_ptr.vmem [resolvable:$false] %s2792_s30 }
  0xb3   : > { %s2794_s6 = scalar_lea.vmem %s2793_s30, 4096  ;;  %p2795_p10 = scmp.lt.s32.totalorder %s3304_s7, %s2793_s30 }
  0xb4   : > { %p2790_p6 = pnand %p2788_p9, %p2774_p1  ;;  %p2796_p5 = scmp.lt.s32.totalorder %s2794_s6, %s2787_s3 }
  0xb6   : > { %p2791_p13 = pneg %p2790_p6  ;;  %p2797_p4 = por %p2796_p5, %p2795_p10 }
  0xb8   : > { %p2798_p7 = pnand %p2797_p4, %p2791_p13 }
  0xba   : > { %2801 = shalt.err (!%p2798_p7)
}
  0xbb   : > { %s2969_s10 = smov 128   ;;  %s2970_s5 = smov 8  }
  0xbc   : > { %2451 = dma.hbm_to_vmem [thread:$0]  (!%p3308_p3), %s3302_s2, 2048, %s3304_s7, %s3312_s29, %s2969_s10, %s2969_s10, %s2970_s5  }
  0xbd   : > { %p4195_p1 = scmp.ne.s32.totalorder %s4179_s15, 0 }
  0xbe   : > { %p4196_p11 = scmp.ne.s32.totalorder (!%p4195_p1), %s4171_s25, 0 }
  0xbf   : > { %389 = sbr.rel (%p4195_p1) target bundleno = 1680 (0x690), region = 56 }
  0xc6   : > { %2887 = dma.done.wait (%p4196_p11), [#allocation8], 16  }
  0xc7   : > { %2889 = vsyncadd (%p4196_p11), [#allocation8], 4294967280  ;;  %s395_s12 = sand.u32 1, %s2936_s16   ;;  %p4197_p8 = scmp.ne.s32.totalorder %s4172_s27, 0 }
  0xc8   : > { %s2078_s24 = sshll.u32 %s395_s12, 6  ;;  %s396_s28 = scalar_lea.sflag [#allocation6], %s395_s12 }
  0xc9   : > { %s3347_s9 = scalar_lea.vmem [#allocation9], %s2078_s24 }
  0xca   : > { %2891 = dma.done.wait (%p4197_p8), %s396_s28, 1024  }
  0xcb   : > { %2893 = vsyncadd (%p4197_p8), %s396_s28, 4294966272 }
  0xcc   : > { %2895 = dma.done.wait (%p4196_p11), [#allocation11], 2048  }
  0xcd   : > { %2897 = vsyncadd (%p4196_p11), [#allocation11], 4294965248  ;;  %s4198_s15 = sld [smem:[#allocation25_spill]]  ;;  %s412_s2 = sand.u32 1, %s2924_s13  }
  0xce   : > { %s2081_s7 = sshll.u32 %s412_s2, 7  ;;  %s413_s0 = scalar_lea.sflag [#allocation14], %s412_s2 }
  0xcf   : > { %s3358_s29 = scalar_lea.vmem [#allocation13], %s2081_s7 }
  0xd3   : > { %p4199_p3 = scmp.ne.s32.totalorder %s4198_s15, 0 }
  0xd5   : > { %2899 = dma.done.wait (%p4199_p3), %s413_s0, 2048  }
  0xd6   : > { %2901 = vsyncadd (%p4199_p3), %s413_s0, 4294965248 }
  0xd7   : > { %421 = sfence }
  0xd8   : > { %s4200_s27 = sld [smem:[#allocation22_spill]]  ;;  %s4201_s3 = sld [smem:[#allocation23_spill]] }
  0xd9   : > { %s4202_s10 = sld [smem:[#allocation24_spill]] }
  0xde   : > { %s454_s4 = sand.u32 1, %s4200_s27   ;;  %s3366_s30 = sshll.u32 %s4201_s3, 7 }
  0xdf   : > { %s2082_s25 = sshll.u32 %s454_s4, 7  ;;  %p2084_p2 = scmp.ne.s32.totalorder %s4202_s10, 0 }
  0xe0   : > { %s3370_s6 = scalar_lea.vmem [#allocation15], %s2082_s25  ;;  %v2585_v0 = vld [vmem:[#allocation10] sm:$0xff] (!%p2084_p2)   ;;  %v2586_v1 = vld [vmem:[#allocation10 + $0x8] sm:$0xff] (!%p2084_p2)   ;;  %v2587_v2 = vld [vmem:[#allocation10 + $0x10] sm:$0xff] (!%p2084_p2)   ;;  %s4203_s24 = sld [smem:[#allocation31_spill]] (!%p2084_p2)  ;;  %v782_v32 = vlaneseq (!%p2084_p2) }
  0xe1   : > { %469 = sbr.rel (%p2084_p2) target bundleno = 1056 (0x420), region = 80  ;;  %2321 = vmatprep.subr.bf16.mxu0 (!%p2084_p2), %v2585_v0  ;;  %v2588_v3 = vld [vmem:[#allocation10 + $0x18] sm:$0xff] (!%p2084_p2)   ;;  %v2593_v4 = vld [vmem:[%s3347_s9] sm:$0xff] (!%p2084_p2)   ;;  %v2590_v6 = vld [vmem:[#allocation10 + $0x28] sm:$0xff] (!%p2084_p2)   ;;  %s4204_s15 = sld [smem:[#allocation32_spill]] (!%p2084_p2) }
  0xe2   : > { %2322 = vmatpush3.bf16.msra.mxu0 (!%p2084_p2), %v2585_v0  ;;  %2337 = vmatprep.mubr.bf16.mxu0 (!%p2084_p2), %v2593_v4  ;;  %v2589_v5 = vld [vmem:[#allocation10 + $0x20] sm:$0xff] (!%p2084_p2)   ;;  %v2591_v7 = vld [vmem:[#allocation10 + $0x30] sm:$0xff] (!%p2084_p2)   ;;  %v2592_v8 = vld [vmem:[#allocation10 + $0x38] sm:$0xff] (!%p2084_p2)   ;;  %v3402_v41 = vand.u32 (!%p2084_p2), 127, %v782_v32  ;;  %s4205_s0 = sld [smem:[#allocation33_spill]] (!%p2084_p2)  ;;  %s1235_s27 = sld [smem:[#allocation5]] (!%p2084_p2) }
  0xe3   : > { %2323 = vmatprep.subr.bf16.mxu0 (!%p2084_p2), %v2586_v1  ;;  %v2594_v9 = vld [vmem:[%s3347_s9 + $0x8] sm:$0xff] (!%p2084_p2)   ;;  %v2595_v10 = vld [vmem:[%s3347_s9 + $0x10] sm:$0xff] (!%p2084_p2)   ;;  %v2596_v11 = vld [vmem:[%s3347_s9 + $0x18] sm:$0xff] (!%p2084_p2)   ;;  %s4206_s10 = sld [smem:[#allocation35_spill]] (!%p2084_p2)  ;;  %s1223_s5 = sshra.s32 (!%p2084_p2), %s3366_s30, 4 }
  0xe4   : > { %v2597_v12 = vld [vmem:[%s3347_s9 + $0x20] sm:$0xff] (!%p2084_p2)   ;;  %v2598_v13 = vld [vmem:[%s3347_s9 + $0x28] sm:$0xff] (!%p2084_p2)   ;;  %v2599_v14 = vld [vmem:[%s3347_s9 + $0x30] sm:$0xff] (!%p2084_p2)   ;;  %vm784_vm0 = vcmp.lt.s32.totalorder (!%p2084_p2), %v3402_v41, 16  ;;  %s2113_s12 = sshll.u32 (!%p2084_p2), %s1223_s5, 3 }
  0xe5   : > { %v2600_v15 = vld [vmem:[%s3347_s9 + $0x38] sm:$0xff] (!%p2084_p2)   ;;  %s3708_s28 = scalar_lea.vmem (!%p2084_p2), [#allocation2], %s2113_s12 }
  0xe6   : > { %2324 = vmatpush3.bf16.msra.mxu0 (!%p2084_p2), %v2586_v1  ;;  %v3384_v16 = vld [vmem:[%s4203_s24] ss:$0 sm:$0xff] (!%p2084_p2)  ;;  %v2608_v41 = vld [vmem:[#allocation12 + $0x38] sm:$0xff] (!%p2084_p2)   ;;  %s3702_s24 = scalar_lea.vmem (!%p2084_p2), [#allocation4], %s3366_s30 }
  0xe7   : > { %2325 = vmatprep.subr.bf16.mxu0 (!%p2084_p2), %v2587_v2 }
  0xea   : > { %2326 = vmatpush3.bf16.msra.mxu0 %v2587_v2 }
  0xeb   : > { %2327 = vmatprep.subr.bf16.mxu0 %v2588_v3 }
  0xee   : > { %2328 = vmatpush3.bf16.msra.mxu0 %v2588_v3 }
  0xef   : > { %2329 = vmatprep.subr.bf16.mxu0 %v2589_v5 }
  0xf2   : > { %2330 = vmatpush3.bf16.msra.mxu0 %v2589_v5 }
  0xf3   : > { %2331 = vmatprep.subr.bf16.mxu0 %v2590_v6 }
  0xf6   : > { %2332 = vmatpush3.bf16.msra.mxu0 %v2590_v6 }
  0xf7   : > { %2333 = vmatprep.subr.bf16.mxu0 %v2591_v7 }
  0xfa   : > { %2334 = vmatpush3.bf16.msra.mxu0 %v2591_v7 }
  0xfb   : > { %2335 = vmatprep.subr.bf16.mxu0 %v2592_v8 }
  0xfe   : > { %2336 = vmatpush3.bf16.msra.mxu0 %v2592_v8 }
 0x101   : > { %2338 = vmatmul.mubr.bf16.vlgmr.msra.gmra.mrb[0].mxu0 %v2594_v9 }
 0x102   : > { %2341 = vmatprep.mubr.bf16.mxu0 %v2595_v10 }
 0x109   : > { %2342 = vmatmul.mubr.bf16.gmra.mrb[4].mxu0 %v2596_v11 }
 0x10a   : > { %2345 = vmatprep.mubr.bf16.mxu0 %v2597_v12 }
 0x111   : > { %2346 = vmatmul.mubr.bf16.gmra.mrb[8].mxu0 %v2598_v13 }
 0x112   : > { %2349 = vmatprep.mubr.bf16.mxu0 %v2599_v14 }
 0x119   : > { %2350 = vmatmul.mubr.bf16.gmra.mrb[12].mxu0 %v2600_v15 }
 0x1d4   : > { %v2339_v17 = vpop.f32.mrb[0].mxu0 }
 0x1d5   : > { %v648_v18 = vadd.f32 %v2339_v17, %v3384_v16  ;;  %v639_v19 = vpop.f32.mrb[1].mxu0 }
 0x1d6   : > { %v640_v20 = vadd.f32 %v3384_v16, %v639_v19  ;;  %v2340_v21 = vpop.f32.mrb[2].mxu0 }
 0x1d7   : > { %v720_v22 = vmul.f32 0.70710677, %v648_v18  ;;  %v651_v23 = vadd.f32 %v2340_v21, %v3384_v16  ;;  %v642_v24 = vpop.f32.mrb[3].mxu0  ;;  %v704_v45 = vmul.f32 0.5, %v648_v18 }
 0x1d8   : > { %v718_v25 = vmul.f32 0.70710677, %v640_v20  ;;  %v643_v26 = vadd.f32 %v3384_v16, %v642_v24  ;;  %v702_v49 = vmul.f32 0.5, %v640_v20 }
 0x1d9   : > { %2609 = verf.f32 %v720_v22  ;;  %v721_v27 = vmul.f32 0.70710677, %v651_v23  ;;  %v705_v62 = vmul.f32 0.5, %v651_v23 }
 0x1da   : > { %2611 = verf.f32 %v718_v25  ;;  %v719_v28 = vmul.f32 0.70710677, %v643_v26  ;;  %v703_v7 = vmul.f32 0.5, %v643_v26 }
 0x1db   : > { %2613 = verf.f32 %v721_v27 }
 0x1dc   : > { %v2343_v29 = vpop.f32.mrb[4].mxu0  ;;  %2615 = verf.f32 %v719_v28 }
 0x1dd   : > { %v3391_v30 = vadd.f32 %v2343_v29, %v3384_v16  ;;  %v655_v31 = vpop.f32.mrb[5].mxu0 }
 0x1de   : > { %v656_v33 = vadd.f32 %v3384_v16, %v655_v31  ;;  %v2344_v34 = vpop.f32.mrb[6].mxu0 }
 0x1df   : > { %v724_v35 = vmul.f32 0.70710677, %v3391_v30  ;;  %v3396_v36 = vadd.f32 %v2344_v34, %v3384_v16  ;;  %v658_v37 = vpop.f32.mrb[7].mxu0  ;;  %v708_v19 = vmul.f32 0.5, %v3391_v30 }
 0x1e0   : > { %v722_v38 = vmul.f32 0.70710677, %v656_v33  ;;  %v3399_v39 = vadd.f32 %v3384_v16, %v658_v37  ;;  %v706_v20 = vmul.f32 0.5, %v656_v33 }
 0x1e1   : > { %2617 = verf.f32 %v724_v35  ;;  %v725_v40 = vmul.f32 0.70710677, %v3396_v36 }
 0x1e2   : > { %2619 = verf.f32 %v722_v38  ;;  %v723_v42 = vmul.f32 0.70710677, %v3399_v39  ;;  %v707_v28 = vmul.f32 0.5, %v3399_v39  ;;  %v709_v39 = vmul.f32 0.5, %v3396_v36 }
 0x1e3   : > { %v2610_v43 = vpop.eup %2609  ;;  %2621 = verf.f32 %v725_v40 }
 0x1e4   : > { %v2612_v44 = vpop.eup %2611  ;;  %2623 = verf.f32 %v723_v42  ;;  %v2347_v46 = vpop.f32.mrb[8].mxu0  ;;  %v752_v47 = vadd.f32 1.0, %v2610_v43 }
 0x1e5   : > { %v2614_v48 = vpop.eup %2613  ;;  %v3406_v50 = vadd.f32 %v2347_v46, %v3384_v16  ;;  %v671_v51 = vpop.f32.mrb[9].mxu0  ;;  %v750_v52 = vadd.f32 1.0, %v2612_v44 }
 0x1e6   : > { %v3410_v53 = vadd.f32 %v3384_v16, %v671_v51  ;;  %v2348_v54 = vpop.f32.mrb[10].mxu0  ;;  %v3412_v55 = vmul.f32 %v752_v47, %v704_v45  ;;  %v753_v56 = vadd.f32 1.0, %v2614_v48  ;;  %v2616_v61 = vpop.eup %2615 }
 0x1e7   : > { %v728_v57 = vmul.f32 0.70710677, %v3406_v50  ;;  %v3416_v58 = vadd.f32 %v2348_v54, %v3384_v16  ;;  %v674_v59 = vpop.f32.mrb[11].mxu0  ;;  %v3418_v60 = vmul.f32 %v750_v52, %v702_v49  ;;  %v751_v8 = vadd.f32 1.0, %v2616_v61 }
 0x1e8   : > { %v726_v63 = vmul.f32 0.70710677, %v3410_v53  ;;  %v675_v0 = vadd.f32 %v3384_v16, %v674_v59  ;;  %v787_v1 = vsel %vm784_vm0, %v3412_v55, 0.0  ;;  %v3429_v5 = vmul.f32 %v753_v56, %v705_v62 }
 0x1e9   : > { %2625 = verf.f32 %v728_v57  ;;  %v729_v2 = vmul.f32 0.70710677, %v3416_v58  ;;  %805 = vadd.xlane.f32.xlu1 %v787_v1  ;;  %v785_v3 = vsel %vm784_vm0, %v3418_v60, 0.0  ;;  %v3437_v15 = vmul.f32 %v751_v8, %v703_v7 }
 0x1ea   : > { %2627 = verf.f32 %v726_v63  ;;  %v727_v4 = vmul.f32 0.70710677, %v675_v0  ;;  %801 = vadd.xlane.f32.xlu0 %v785_v3  ;;  %v788_v11 = vsel %vm784_vm0, %v3429_v5, 0.0  ;;  %v710_v44 = vmul.f32 0.5, %v3410_v53 }
 0x1eb   : > { %v2618_v6 = vpop.eup %2617  ;;  %2629 = verf.f32 %v729_v2  ;;  %v786_v25 = vsel %vm784_vm0, %v3437_v15, 0.0  ;;  %v711_v36 = vmul.f32 0.5, %v675_v0  ;;  %v712_v53 = vmul.f32 0.5, %v3406_v50 }
 0x1ec   : > { %v2620_v9 = vpop.eup %2619  ;;  %2631 = verf.f32 %v727_v4  ;;  %v2351_v10 = vpop.f32.mrb[12].mxu0  ;;  %v756_v27 = vadd.f32 1.0, %v2618_v6  ;;  %v713_v63 = vmul.f32 0.5, %v3416_v58 }
 0x1ed   : > { %v2622_v12 = vpop.eup %2621  ;;  %v3435_v13 = vadd.f32 %v2351_v10, %v3384_v16  ;;  %807 = vadd.xlane.f32.xlu1 %v788_v11  ;;  %v687_v14 = vpop.f32.mrb[13].mxu0  ;;  %v754_v17 = vadd.f32 1.0, %v2620_v9 }
 0x1ee   : > { %v2624_v18 = vpop.eup %2623  ;;  %v688_v21 = vadd.f32 %v3384_v16, %v687_v14  ;;  %v2352_v22 = vpop.f32.mrb[14].mxu0  ;;  %803 = vadd.xlane.f32.xlu0 %v786_v25  ;;  %v757_v34 = vadd.f32 1.0, %v2622_v12 }
 0x1ef   : > { %v732_v23 = vmul.f32 0.70710677, %v3435_v13  ;;  %v3443_v24 = vadd.f32 %v2352_v22, %v3384_v16  ;;  %v690_v26 = vpop.f32.mrb[15].mxu0  ;;  %v3450_v31 = vmul.f32 %v754_v17, %v706_v20  ;;  %v755_v33 = vadd.f32 1.0, %v2624_v18 }
 0x1f0   : > { %v730_v29 = vmul.f32 0.70710677, %v688_v21  ;;  %v691_v30 = vadd.f32 %v3384_v16, %v690_v26  ;;  %v3459_v16 = vmul.f32 %v756_v27, %v708_v19  ;;  %v3465_v46 = vmul.f32 %v757_v34, %v709_v39 }
 0x1f1   : > { %2633 = verf.f32 %v732_v23  ;;  %v733_v32 = vmul.f32 0.70710677, %v3443_v24  ;;  %v789_v37 = vsel %vm784_vm0, %v3450_v31, 0.0  ;;  %v3457_v40 = vmul.f32 %v755_v33, %v707_v28 }
 0x1f2   : > { %2635 = verf.f32 %v730_v29  ;;  %v731_v35 = vmul.f32 0.70710677, %v691_v30  ;;  %809 = vadd.xlane.f32.xlu0 %v789_v37  ;;  %v791_v49 = vsel %vm784_vm0, %v3459_v16, 0.0  ;;  %v792_v56 = vsel %vm784_vm0, %v3465_v46, 0.0 }
 0x1f3   : > { %v2626_v38 = vpop.eup %2625  ;;  %2637 = verf.f32 %v733_v32  ;;  %v790_v45 = vsel %vm784_vm0, %v3457_v40, 0.0  ;;  %v714_v3 = vmul.f32 0.5, %v688_v21  ;;  %v715_v8 = vmul.f32 0.5, %v691_v30 }
 0x1f4   : > { %v2628_v42 = vpop.eup %2627  ;;  %2639 = verf.f32 %v731_v35  ;;  %811 = vadd.xlane.f32.xlu1 %v790_v45  ;;  %v760_v54 = vadd.f32 1.0, %v2626_v38  ;;  %v716_v12 = vmul.f32 0.5, %v3435_v13  ;;  %v717_v20 = vmul.f32 0.5, %v3443_v24  ;;  %v2601_v24 = vld [vmem:[#allocation12] sm:$0xff]  }
 0x1f5   : > { %v2630_v43 = vpop.eup %2629  ;;  %v758_v47 = vadd.f32 1.0, %v2628_v42  ;;  %2353 = vmatprep.subr.bf16.mxu1 %v2601_v24 }
 0x1f6   : > { %v2632_v48 = vpop.eup %2631  ;;  %813 = vadd.xlane.f32.xlu0 %v791_v49  ;;  %v761_v61 = vadd.f32 1.0, %v2630_v43  ;;  %v3485_v0 = vmul.f32 %v760_v54, %v712_v53  ;;  %2354 = vmatpush3.bf16.msra.mxu1 %v2601_v24 }
 0x1f7   : > { %v3470_v51 = vmul.f32 %v758_v47, %v710_v44  ;;  %v759_v52 = vadd.f32 1.0, %v2632_v48 }
 0x1f8   : > { %815 = vadd.xlane.f32.xlu1 %v792_v56  ;;  %v3487_v4 = vmul.f32 %v761_v61, %v713_v63  ;;  %v795_v58 = vsel %vm784_vm0, %v3485_v0, 0.0 }
 0x1f9   : > { %v793_v57 = vsel %vm784_vm0, %v3470_v51, 0.0  ;;  %v3479_v59 = vmul.f32 %v759_v52, %v711_v36 }
 0x1fa   : > { %817 = vadd.xlane.f32.xlu0 %v793_v57  ;;  %v796_v14 = vsel %vm784_vm0, %v3487_v4, 0.0 }
 0x1fb   : > { %v2634_v62 = vpop.eup %2633  ;;  %v794_v50 = vsel %vm784_vm0, %v3479_v59, 0.0 }
 0x1fc   : > { %v2636_v1 = vpop.eup %2635  ;;  %819 = vadd.xlane.f32.xlu1 %v794_v50  ;;  %v764_v11 = vadd.f32 1.0, %v2634_v62 }
 0x1fd   : > { %v2638_v2 = vpop.eup %2637  ;;  %v762_v6 = vadd.f32 1.0, %v2636_v1 }
 0x1fe   : > { %v2640_v7 = vpop.eup %2639  ;;  %821 = vadd.xlane.f32.xlu0 %v795_v58  ;;  %v765_v19 = vadd.f32 1.0, %v2638_v2  ;;  %v3507_v13 = vmul.f32 %v764_v11, %v716_v12 }
 0x1ff   : > { %v3492_v9 = vmul.f32 %v762_v6, %v714_v3  ;;  %v763_v10 = vadd.f32 1.0, %v2640_v7 }
 0x200   : > { %823 = vadd.xlane.f32.xlu1 %v796_v14  ;;  %v3509_v22 = vmul.f32 %v765_v19, %v717_v20  ;;  %v799_v23 = vsel %vm784_vm0, %v3507_v13, 0.0 }
 0x201   : > { %v797_v17 = vsel %vm784_vm0, %v3492_v9, 0.0  ;;  %v3501_v18 = vmul.f32 %v763_v10, %v715_v8 }
 0x202   : > { %825 = vadd.xlane.f32.xlu0 %v797_v17  ;;  %v800_v25 = vsel %vm784_vm0, %v3509_v22, 0.0 }
 0x203   : > { %v798_v21 = vsel %vm784_vm0, %v3501_v18, 0.0 }
 0x204   : > { %827 = vadd.xlane.f32.xlu1 %v798_v21 }
 0x206   : > { %829 = vadd.xlane.f32.xlu0 %v799_v23 }
 0x208   : > { %831 = vadd.xlane.f32.xlu1 %v800_v25  ;;  %v2602_v25 = vld [vmem:[#allocation12 + $0x8] sm:$0xff]  }
 0x209   : > { %2355 = vmatprep.subr.bf16.mxu1 %v2602_v25 }
 0x20a   : > { %2356 = vmatpush3.bf16.msra.mxu1 %v2602_v25 }
 0x276   : > { %v806_v26 = vpop.xlane.xlu1 %805 }
 0x277   : > { %v835_v27 = vmul.f32 0.0625, %v806_v26  ;;  %v802_v28 = vpop.xlane.xlu0 %801 }
 0x278   : > { %v833_v29 = vmul.f32 0.0625, %v802_v28 }
 0x279   : > { %v851_v30 = vsub.f32 %v3412_v55, %v835_v27 }
 0x27a   : > { %v849_v32 = vsub.f32 %v3418_v60, %v833_v29  ;;  %v808_v33 = vpop.xlane.xlu1 %807 }
 0x27b   : > { %v836_v34 = vmul.f32 0.0625, %v808_v33  ;;  %v804_v37 = vpop.xlane.xlu0 %803  ;;  %v3527_v42 = vsel %vm784_vm0, %v851_v30, 0.0 }
 0x27c   : > { %v3521_v35 = vsel %vm784_vm0, %v849_v32, 0.0  ;;  %v834_v39 = vmul.f32 0.0625, %v804_v37  ;;  %v883_v44 = vmul.f32 %v3527_v42, %v3527_v42 }
 0x27d   : > { %v881_v38 = vmul.f32 %v3521_v35, %v3521_v35  ;;  %v852_v55 = vsub.f32 %v3429_v5, %v836_v34 }
 0x27e   : > { %v850_v60 = vsub.f32 %v3437_v15, %v834_v39  ;;  %v2603_v39 = vld [vmem:[#allocation12 + $0x10] sm:$0xff]  }
 0x27f   : > { %897 = vadd.xlane.f32.xlu0 %v881_v38  ;;  %v810_v43 = vpop.xlane.xlu0 %809  ;;  %v3542_v5 = vsel %vm784_vm0, %v852_v55, 0.0  ;;  %2357 = vmatprep.subr.bf16.mxu1 %v2603_v39 }
 0x280   : > { %v837_v45 = vmul.f32 0.0625, %v810_v43  ;;  %v3535_v47 = vsel %vm784_vm0, %v850_v60, 0.0  ;;  %v884_v61 = vmul.f32 %v3542_v5, %v3542_v5  ;;  %2358 = vmatpush3.bf16.msra.mxu1 %v2603_v39 }
 0x281   : > { %v812_v48 = vpop.xlane.xlu1 %811  ;;  %v882_v36 = vmul.f32 %v3535_v47, %v3535_v47 }
 0x282   : > { %v853_v49 = vsub.f32 %v3450_v31, %v837_v45  ;;  %v838_v52 = vmul.f32 0.0625, %v812_v48 }
 0x283   : > { %901 = vadd.xlane.f32.xlu0 %v883_v44  ;;  %899 = vadd.xlane.f32.xlu1 %v882_v36  ;;  %v814_v15 = vpop.xlane.xlu0 %813  ;;  %v2604_v36 = vld [vmem:[#allocation12 + $0x18] sm:$0xff]  }
 0x284   : > { %v854_v54 = vsub.f32 %v3457_v40, %v838_v52  ;;  %v839_v53 = vmul.f32 0.0625, %v814_v15  ;;  %v3547_v56 = vsel %vm784_vm0, %v853_v49, 0.0  ;;  %2359 = vmatprep.subr.bf16.mxu1 %v2604_v36 }
 0x285   : > { %v816_v57 = vpop.xlane.xlu1 %815  ;;  %v885_v31 = vmul.f32 %v3547_v56, %v3547_v56  ;;  %2360 = vmatpush3.bf16.msra.mxu1 %v2604_v36 }
 0x286   : > { %v855_v62 = vsub.f32 %v3459_v16, %v839_v53  ;;  %v840_v63 = vmul.f32 0.0625, %v816_v57  ;;  %v3556_v50 = vsel %vm784_vm0, %v854_v54, 0.0  ;;  %v2606_v54 = vld [vmem:[#allocation12 + $0x28] sm:$0xff]   ;;  %v2607_v53 = vld [vmem:[#allocation12 + $0x30] sm:$0xff]  }
 0x287   : > { %903 = vadd.xlane.f32.xlu1 %v884_v61  ;;  %905 = vadd.xlane.f32.xlu0 %v885_v31  ;;  %v818_v40 = vpop.xlane.xlu0 %817  ;;  %v886_v7 = vmul.f32 %v3556_v50, %v3556_v50 }
 0x288   : > { %v856_v1 = vsub.f32 %v3465_v46, %v840_v63  ;;  %v841_v2 = vmul.f32 0.0625, %v818_v40  ;;  %v3561_v3 = vsel %vm784_vm0, %v855_v62, 0.0 }
 0x289   : > { %v820_v6 = vpop.xlane.xlu1 %819  ;;  %v887_v16 = vmul.f32 %v3561_v3, %v3561_v3 }
 0x28a   : > { %v857_v8 = vsub.f32 %v3470_v51, %v841_v2  ;;  %v842_v58 = vmul.f32 0.0625, %v820_v6  ;;  %v3570_v10 = vsel %vm784_vm0, %v856_v1, 0.0 }
 0x28b   : > { %907 = vadd.xlane.f32.xlu1 %v886_v7  ;;  %909 = vadd.xlane.f32.xlu0 %v887_v16  ;;  %v822_v46 = vpop.xlane.xlu0 %821  ;;  %v888_v19 = vmul.f32 %v3570_v10, %v3570_v10 }
 0x28c   : > { %v858_v11 = vsub.f32 %v3479_v59, %v842_v58  ;;  %v843_v12 = vmul.f32 0.0625, %v822_v46  ;;  %v3575_v14 = vsel %vm784_vm0, %v857_v8, 0.0 }
 0x28d   : > { %v824_v17 = vpop.xlane.xlu1 %823  ;;  %v889_v51 = vmul.f32 %v3575_v14, %v3575_v14 }
 0x28e   : > { %v859_v20 = vsub.f32 %v3485_v0, %v843_v12  ;;  %v844_v21 = vmul.f32 0.0625, %v824_v17  ;;  %v3584_v23 = vsel %vm784_vm0, %v858_v11, 0.0 }
 0x28f   : > { %911 = vadd.xlane.f32.xlu1 %v888_v19  ;;  %913 = vadd.xlane.f32.xlu0 %v889_v51  ;;  %v826_v59 = vpop.xlane.xlu0 %825  ;;  %v890_v0 = vmul.f32 %v3584_v23, %v3584_v23 }
 0x290   : > { %v860_v24 = vsub.f32 %v3487_v4, %v844_v21  ;;  %v845_v26 = vmul.f32 0.0625, %v826_v59  ;;  %v3589_v27 = vsel %vm784_vm0, %v859_v20, 0.0 }
 0x291   : > { %v828_v28 = vpop.xlane.xlu1 %827  ;;  %v891_v29 = vmul.f32 %v3589_v27, %v3589_v27 }
 0x292   : > { %v861_v30 = vsub.f32 %v3492_v9, %v845_v26  ;;  %v846_v32 = vmul.f32 0.0625, %v828_v28  ;;  %v3598_v33 = vsel %vm784_vm0, %v860_v24, 0.0 }
 0x293   : > { %915 = vadd.xlane.f32.xlu1 %v890_v0  ;;  %917 = vadd.xlane.f32.xlu0 %v891_v29  ;;  %v830_v4 = vpop.xlane.xlu0 %829  ;;  %v892_v9 = vmul.f32 %v3598_v33, %v3598_v33 }
 0x294   : > { %v862_v34 = vsub.f32 %v3501_v18, %v846_v32  ;;  %v847_v37 = vmul.f32 0.0625, %v830_v4  ;;  %v3603_v38 = vsel %vm784_vm0, %v861_v30, 0.0  ;;  %v3633_v30 = vld [vmem:[%s4204_s15] ss:$0 sm:$0xff] }
 0x295   : > { %v832_v55 = vpop.xlane.xlu1 %831  ;;  %v893_v60 = vmul.f32 %v3603_v38, %v3603_v38 }
 0x296   : > { %v863_v43 = vsub.f32 %v3507_v13, %v847_v37  ;;  %v848_v44 = vmul.f32 0.0625, %v832_v55  ;;  %v3612_v45 = vsel %vm784_vm0, %v862_v34, 0.0 }
 0x297   : > { %919 = vadd.xlane.f32.xlu1 %v892_v9  ;;  %921 = vadd.xlane.f32.xlu0 %v893_v60  ;;  %v894_v49 = vmul.f32 %v3612_v45, %v3612_v45 }
 0x298   : > { %v864_v18 = vsub.f32 %v3509_v22, %v848_v44  ;;  %v3617_v48 = vsel %vm784_vm0, %v863_v43, 0.0  ;;  %v2605_v22 = vld [vmem:[#allocation12 + $0x20] sm:$0xff]  }
 0x299   : > { %v895_v13 = vmul.f32 %v3617_v48, %v3617_v48  ;;  %2361 = vmatprep.subr.bf16.mxu1 %v2605_v22  ;;  %v3641_v44 = vld [vmem:[%s4205_s0] ss:$0 sm:$0xff] }
 0x29a   : > { %v3625_v52 = vsel %vm784_vm0, %v864_v18, 0.0  ;;  %2362 = vmatpush3.bf16.msra.mxu1 %v2605_v22 }
 0x29b   : > { %923 = vadd.xlane.f32.xlu1 %v894_v49  ;;  %925 = vadd.xlane.f32.xlu0 %v895_v13  ;;  %v896_v15 = vmul.f32 %v3625_v52, %v3625_v52 }
 0x29c   : > { %2363 = vmatprep.subr.bf16.mxu1 %v2606_v54 }
 0x29e   : > { %2364 = vmatpush3.bf16.msra.mxu1 %v2606_v54 }
 0x29f   : > { %927 = vadd.xlane.f32.xlu1 %v896_v15  ;;  %2365 = vmatprep.subr.bf16.mxu1 %v2607_v53 }
 0x2a2   : > { %2366 = vmatpush3.bf16.msra.mxu1 %v2607_v53 }
 0x2a3   : > { %2367 = vmatprep.subr.bf16.mxu1 %v2608_v41 }
 0x2a6   : > { %2368 = vmatpush3.bf16.msra.mxu1 %v2608_v41 }
 0x30c   : > { %v898_v57 = vpop.xlane.xlu0 %897 }
 0x30d   : > { %v929_v61 = vmul.f32 0.0625, %v898_v57 }
 0x30f   : > { %v945_v31 = vadd.f32 1e-05, %v929_v61 }
 0x310   : > { %v902_v62 = vpop.xlane.xlu0 %901  ;;  %v900_v40 = vpop.xlane.xlu1 %899 }
 0x311   : > { %2641 = vrsqrt.f32 %v945_v31  ;;  %v931_v63 = vmul.f32 0.0625, %v902_v62  ;;  %v930_v1 = vmul.f32 0.0625, %v900_v40 }
 0x313   : > { %v947_v2 = vadd.f32 1e-05, %v931_v63  ;;  %v946_v6 = vadd.f32 1e-05, %v930_v1 }
 0x314   : > { %v904_v7 = vpop.xlane.xlu1 %903  ;;  %v906_v16 = vpop.xlane.xlu0 %905 }
 0x315   : > { %2643 = vrsqrt.f32 %v947_v2  ;;  %v932_v8 = vmul.f32 0.0625, %v904_v7  ;;  %v933_v58 = vmul.f32 0.0625, %v906_v16 }
 0x316   : > { %2645 = vrsqrt.f32 %v946_v6 }
 0x317   : > { %v948_v46 = vadd.f32 1e-05, %v932_v8  ;;  %v949_v11 = vadd.f32 1e-05, %v933_v58 }
 0x318   : > { %v908_v12 = vpop.xlane.xlu1 %907  ;;  %v910_v17 = vpop.xlane.xlu0 %909 }
 0x319   : > { %2647 = vrsqrt.f32 %v948_v46  ;;  %v934_v51 = vmul.f32 0.0625, %v908_v12  ;;  %v935_v20 = vmul.f32 0.0625, %v910_v17 }
 0x31a   : > { %2649 = vrsqrt.f32 %v949_v11 }
 0x31b   : > { %v2642_v19 = vpop.eup %2641  ;;  %v950_v21 = vadd.f32 1e-05, %v934_v51  ;;  %v951_v59 = vadd.f32 1e-05, %v935_v20 }
 0x31c   : > { %v912_v25 = vpop.xlane.xlu1 %911  ;;  %v914_v24 = vpop.xlane.xlu0 %913  ;;  %v977_v26 = vmul.f32 %v2642_v19, %v3521_v35 }
 0x31d   : > { %2651 = vrsqrt.f32 %v950_v21  ;;  %v936_v0 = vmul.f32 0.0625, %v912_v25  ;;  %v937_v29 = vmul.f32 0.0625, %v914_v24 }
 0x31e   : > { %2653 = vrsqrt.f32 %v951_v59  ;;  %v1000_v9 = vmul.f32 %v3633_v30, %v977_v26 }
 0x31f   : > { %v2644_v28 = vpop.eup %2643  ;;  %v952_v4 = vadd.f32 1e-05, %v936_v0  ;;  %v953_v34 = vadd.f32 1e-05, %v937_v29 }
 0x320   : > { %v2646_v32 = vpop.eup %2645  ;;  %v916_v37 = vpop.xlane.xlu1 %915  ;;  %v979_v35 = vmul.f32 %v2644_v28, %v3527_v42  ;;  %v1023_v54 = vadd.f32 %v3641_v44, %v1000_v9 }
 0x321   : > { %v918_v39 = vpop.xlane.xlu0 %917  ;;  %v978_v55 = vmul.f32 %v2646_v32, %v3535_v47  ;;  %2655 = vrsqrt.f32 %v952_v4  ;;  %v938_v60 = vmul.f32 0.0625, %v916_v37 }
 0x322   : > { %v939_v43 = vmul.f32 0.0625, %v918_v39  ;;  %2657 = vrsqrt.f32 %v953_v34  ;;  %v1002_v41 = vmul.f32 %v3633_v30, %v979_v35 }
 0x323   : > { %v1001_v18 = vmul.f32 %v3633_v30, %v978_v55  ;;  %v2648_v36 = vpop.eup %2647  ;;  %v954_v49 = vadd.f32 1e-05, %v938_v60 }
 0x324   : > { %v955_v13 = vadd.f32 1e-05, %v939_v43  ;;  %v2650_v22 = vpop.eup %2649  ;;  %v920_v47 = vpop.xlane.xlu1 %919  ;;  %v980_v53 = vmul.f32 %v2648_v36, %v3542_v5  ;;  %v1025_v5 = vadd.f32 %v3641_v44, %v1002_v41 }
 0x325   : > { %v922_v15 = vpop.xlane.xlu0 %921  ;;  %v1024_v42 = vadd.f32 %v3641_v44, %v1001_v18  ;;  %2659 = vrsqrt.f32 %v954_v49  ;;  %v940_v57 = vmul.f32 0.0625, %v920_v47  ;;  %v981_v31 = vmul.f32 %v2650_v22, %v3547_v56 }
 0x326   : > { %v941_v61 = vmul.f32 0.0625, %v922_v15  ;;  %2661 = vrsqrt.f32 %v955_v13  ;;  %v1003_v63 = vmul.f32 %v3633_v30, %v980_v53 }
 0x327   : > { %v1039_v62 = vpack.c.bf16 %v1024_v42, %v1023_v54  ;;  %v2652_v40 = vpop.eup %2651  ;;  %v956_v1 = vadd.f32 1e-05, %v940_v57  ;;  %v1004_v46 = vmul.f32 %v3633_v30, %v981_v31 }
 0x328   : > { %v957_v2 = vadd.f32 1e-05, %v941_v61  ;;  %v2654_v6 = vpop.eup %2653  ;;  %v924_v7 = vpop.xlane.xlu1 %923  ;;  %v1026_v8 = vadd.f32 %v3641_v44, %v1003_v63  ;;  %v982_v58 = vmul.f32 %v2652_v40, %v3556_v50 }
 0x329   : > { %2369 = vmatprep.mubr.bf16.mxu1 %v1039_v62  ;;  %v926_v16 = vpop.xlane.xlu0 %925  ;;  %2663 = vrsqrt.f32 %v956_v1  ;;  %v942_v56 = vmul.f32 0.0625, %v924_v7  ;;  %v983_v19 = vmul.f32 %v2654_v6, %v3561_v3  ;;  %v1027_v24 = vadd.f32 %v3641_v44, %v1004_v46 }
 0x32a   : > { %v943_v11 = vmul.f32 0.0625, %v926_v16  ;;  %2665 = vrsqrt.f32 %v957_v2  ;;  %v1040_v12 = vpack.c.bf16 %v1026_v8, %v1025_v5  ;;  %v1005_v17 = vmul.f32 %v3633_v30, %v982_v58  ;;  %v3690_v16 = vld [vmem:[%s4206_s10] ss:$0 sm:$0xff] }
 0x32b   : > { %v2656_v51 = vpop.eup %2655  ;;  %v958_v20 = vadd.f32 1e-05, %v942_v56  ;;  %v1006_v28 = vmul.f32 %v3633_v30, %v983_v19  ;;  %v3693_v5 = vstv %s1235_s27 }
 0x32c   : > { %v959_v21 = vadd.f32 1e-05, %v943_v11  ;;  %v2658_v59 = vpop.eup %2657  ;;  %v928_v25 = vpop.xlane.xlu1 %927  ;;  %2370 = vmatmul.mubr.bf16.vlgmr.msra.gmra.mrb[0].mxu1 %v1040_v12  ;;  %v1028_v50 = vadd.f32 %v3641_v44, %v1005_v17  ;;  %v984_v26 = vmul.f32 %v2656_v51, %v3570_v10 }
 0x32d   : > { %2667 = vrsqrt.f32 %v958_v20  ;;  %v944_v0 = vmul.f32 0.0625, %v928_v25  ;;  %v985_v29 = vmul.f32 %v2658_v59, %v3575_v14  ;;  %v1029_v39 = vadd.f32 %v3641_v44, %v1006_v28 }
 0x32e   : > { %2669 = vrsqrt.f32 %v959_v21  ;;  %v1041_v3 = vpack.c.bf16 %v1028_v50, %v1027_v24  ;;  %v1007_v32 = vmul.f32 %v3633_v30, %v984_v26 }
 0x32f   : > { %v2660_v4 = vpop.eup %2659  ;;  %v960_v34 = vadd.f32 1e-05, %v944_v0  ;;  %v1008_v9 = vmul.f32 %v3633_v30, %v985_v29 }
 0x330   : > { %v2662_v37 = vpop.eup %2661  ;;  %2373 = vmatprep.mubr.bf16.mxu1 %v1041_v3  ;;  %v1030_v55 = vadd.f32 %v3641_v44, %v1007_v32  ;;  %v986_v10 = vmul.f32 %v2660_v4, %v3584_v23 }
 0x331   : > { %2671 = vrsqrt.f32 %v960_v34  ;;  %v987_v35 = vmul.f32 %v2662_v37, %v3589_v27  ;;  %v1031_v36 = vadd.f32 %v3641_v44, %v1008_v9 }
 0x332   : > { %v1042_v14 = vpack.c.bf16 %v1030_v55, %v1029_v39  ;;  %v1009_v60 = vmul.f32 %v3633_v30, %v986_v10 }
 0x333   : > { %v2664_v43 = vpop.eup %2663  ;;  %v1010_v22 = vmul.f32 %v3633_v30, %v987_v35 }
 0x334   : > { %v2666_v18 = vpop.eup %2665  ;;  %2374 = vmatmul.mubr.bf16.gmra.mrb[4].mxu1 %v1042_v14  ;;  %v1032_v49 = vadd.f32 %v3641_v44, %v1009_v60  ;;  %v988_v13 = vmul.f32 %v2664_v43, %v3598_v33 }
 0x335   : > { %v989_v23 = vmul.f32 %v2666_v18, %v3603_v38  ;;  %v1033_v42 = vadd.f32 %v3641_v44, %v1010_v22 }
 0x336   : > { %v1043_v47 = vpack.c.bf16 %v1032_v49, %v1031_v36  ;;  %v1011_v15 = vmul.f32 %v3633_v30, %v988_v13 }
 0x337   : > { %v2668_v27 = vpop.eup %2667  ;;  %v1012_v57 = vmul.f32 %v3633_v30, %v989_v23 }
 0x338   : > { %v2670_v54 = vpop.eup %2669  ;;  %2377 = vmatprep.mubr.bf16.mxu1 %v1043_v47  ;;  %v1034_v53 = vadd.f32 %v3641_v44, %v1011_v15  ;;  %v990_v41 = vmul.f32 %v2668_v27, %v3612_v45 }
 0x339   : > { %v991_v33 = vmul.f32 %v2670_v54, %v3617_v48  ;;  %v1035_v62 = vadd.f32 %v3641_v44, %v1012_v57 }
 0x33a   : > { %v1044_v61 = vpack.c.bf16 %v1034_v53, %v1033_v42  ;;  %v1013_v31 = vmul.f32 %v3633_v30, %v990_v41 }
 0x33b   : > { %v2672_v38 = vpop.eup %2671  ;;  %v1014_v1 = vmul.f32 %v3633_v30, %v991_v33 }
 0x33c   : > { %2378 = vmatmul.mubr.bf16.gmra.mrb[8].mxu1 %v1044_v61  ;;  %v1036_v63 = vadd.f32 %v3641_v44, %v1013_v31  ;;  %v992_v40 = vmul.f32 %v2672_v38, %v3625_v52 }
 0x33d   : > { %v1037_v48 = vadd.f32 %v3641_v44, %v1014_v1 }
 0x33e   : > { %v1045_v2 = vpack.c.bf16 %v1036_v63, %v1035_v62  ;;  %v1015_v45 = vmul.f32 %v3633_v30, %v992_v40 }
 0x340   : > { %2381 = vmatprep.mubr.bf16.mxu1 %v1045_v2  ;;  %v1038_v6 = vadd.f32 %v3641_v44, %v1015_v45 }
 0x342   : > { %v1046_v7 = vpack.c.bf16 %v1038_v6, %v1037_v48 }
 0x344   : > { %2382 = vmatmul.mubr.bf16.gmra.mrb[12].mxu1 %v1046_v7 }
 0x3ff   : > { %v2371_v52 = vpop.f32.mrb[0].mxu1 }
 0x400   : > { %v1161_v30 = vadd.f32 %v2371_v52, %v3690_v16  ;;  %v1152_v8 = vpop.f32.mrb[1].mxu1 }
 0x401   : > { %v1153_v58 = vadd.f32 %v3690_v16, %v1152_v8  ;;  %v2372_v44 = vpop.f32.mrb[2].mxu1 }
 0x402   : > { %v1239_v46 = vmul.f32 %v3693_v5, %v1161_v30  ;;  %v1164_v56 = vadd.f32 %v2372_v44, %v3690_v16  ;;  %v1155_v11 = vpop.f32.mrb[3].mxu1 }
 0x403   : > { %v1237_v12 = vmul.f32 %v3693_v5, %v1153_v58  ;;  %v1156_v17 = vadd.f32 %v3690_v16, %v1155_v11 }
 0x404   : > { %1256 = vst [vmem:[%s3702_s24 + $0x10] sm:$0xff] %v1239_v46  ;;  %v1216_v19 = vpack.c.bf16 %v1164_v56, %v1161_v30  ;;  %v1240_v51 = vmul.f32 %v3693_v5, %v1164_v56 }
 0x405   : > { %1254 = vst [vmem:[%s3702_s24] sm:$0xff] %v1237_v12  ;;  %v1215_v20 = vpack.c.bf16 %v1156_v17, %v1153_v58  ;;  %v1238_v21 = vmul.f32 %v3693_v5, %v1156_v17 }
 0x406   : > { %1228 = vst [vmem:[%s3708_s28 + $0x8] sm:$0xff] %v1216_v19  ;;  %1257 = vst [vmem:[%s3702_s24 + $0x18] sm:$0xff] %v1240_v51 }
 0x407   : > { %1227 = vst [vmem:[%s3708_s28] sm:$0xff] %v1215_v20  ;;  %1255 = vst [vmem:[%s3702_s24 + $0x8] sm:$0xff] %v1238_v21  ;;  %v2375_v59 = vpop.f32.mrb[4].mxu1 }
 0x408   : > { %v1177_v25 = vadd.f32 %v2375_v59, %v3690_v16  ;;  %v1168_v24 = vpop.f32.mrb[5].mxu1 }
 0x409   : > { %v1169_v50 = vadd.f32 %v3690_v16, %v1168_v24  ;;  %v2376_v26 = vpop.f32.mrb[6].mxu1 }
 0x40a   : > { %v1243_v28 = vmul.f32 %v3693_v5, %v1177_v25  ;;  %v1180_v0 = vadd.f32 %v2376_v26, %v3690_v16  ;;  %v1171_v29 = vpop.f32.mrb[7].mxu1 }
 0x40b   : > { %v1241_v3 = vmul.f32 %v3693_v5, %v1169_v50  ;;  %v1172_v32 = vadd.f32 %v3690_v16, %v1171_v29 }
 0x40c   : > { %1260 = vst [vmem:[%s3702_s24 + $0x30] sm:$0xff] %v1243_v28  ;;  %v1218_v4 = vpack.c.bf16 %v1180_v0, %v1177_v25  ;;  %v1244_v34 = vmul.f32 %v3693_v5, %v1180_v0 }
 0x40d   : > { %1258 = vst [vmem:[%s3702_s24 + $0x20] sm:$0xff] %v1241_v3  ;;  %v1217_v37 = vpack.c.bf16 %v1172_v32, %v1169_v50  ;;  %v1242_v39 = vmul.f32 %v3693_v5, %v1172_v32 }
 0x40e   : > { %1230 = vst [vmem:[%s3708_s28 + $0x18] sm:$0xff] %v1218_v4  ;;  %1261 = vst [vmem:[%s3702_s24 + $0x38] sm:$0xff] %v1244_v34 }
 0x40f   : > { %1229 = vst [vmem:[%s3708_s28 + $0x10] sm:$0xff] %v1217_v37  ;;  %1259 = vst [vmem:[%s3702_s24 + $0x28] sm:$0xff] %v1242_v39  ;;  %v2379_v55 = vpop.f32.mrb[8].mxu1 }
 0x410   : > { %v1193_v10 = vadd.f32 %v2379_v55, %v3690_v16  ;;  %v1184_v9 = vpop.f32.mrb[9].mxu1 }
 0x411   : > { %v1185_v35 = vadd.f32 %v3690_v16, %v1184_v9  ;;  %v2380_v14 = vpop.f32.mrb[10].mxu1 }
 0x412   : > { %v1247_v60 = vmul.f32 %v3693_v5, %v1193_v10  ;;  %v1196_v43 = vadd.f32 %v2380_v14, %v3690_v16  ;;  %v1187_v18 = vpop.f32.mrb[11].mxu1 }
 0x413   : > { %v1245_v36 = vmul.f32 %v3693_v5, %v1185_v35  ;;  %v1188_v49 = vadd.f32 %v3690_v16, %v1187_v18 }
 0x414   : > { %1264 = vst [vmem:[%s3702_s24 + $0x50] sm:$0xff] %v1247_v60  ;;  %v1220_v13 = vpack.c.bf16 %v1196_v43, %v1193_v10  ;;  %v1248_v22 = vmul.f32 %v3693_v5, %v1196_v43 }
 0x415   : > { %1262 = vst [vmem:[%s3702_s24 + $0x40] sm:$0xff] %v1245_v36  ;;  %v1219_v23 = vpack.c.bf16 %v1188_v49, %v1185_v35  ;;  %v1246_v47 = vmul.f32 %v3693_v5, %v1188_v49 }
 0x416   : > { %1232 = vst [vmem:[%s3708_s28 + $0x28] sm:$0xff] %v1220_v13  ;;  %1265 = vst [vmem:[%s3702_s24 + $0x58] sm:$0xff] %v1248_v22 }
 0x417   : > { %1231 = vst [vmem:[%s3708_s28 + $0x20] sm:$0xff] %v1219_v23  ;;  %1263 = vst [vmem:[%s3702_s24 + $0x48] sm:$0xff] %v1246_v47  ;;  %v2383_v15 = vpop.f32.mrb[12].mxu1 }
 0x418   : > { %v1209_v27 = vadd.f32 %v2383_v15, %v3690_v16  ;;  %v1200_v54 = vpop.f32.mrb[13].mxu1 }
 0x419   : > { %v1201_v42 = vadd.f32 %v3690_v16, %v1200_v54  ;;  %v2384_v53 = vpop.f32.mrb[14].mxu1 }
 0x41a   : > { %v1251_v41 = vmul.f32 %v3693_v5, %v1209_v27  ;;  %v1212_v57 = vadd.f32 %v2384_v53, %v3690_v16  ;;  %v1203_v33 = vpop.f32.mrb[15].mxu1 }
 0x41b   : > { %v1249_v61 = vmul.f32 %v3693_v5, %v1201_v42  ;;  %v1204_v31 = vadd.f32 %v3690_v16, %v1203_v33 }
 0x41c   : > { %1268 = vst [vmem:[%s3702_s24 + $0x70] sm:$0xff] %v1251_v41  ;;  %v1222_v38 = vpack.c.bf16 %v1212_v57, %v1209_v27  ;;  %v1252_v62 = vmul.f32 %v3693_v5, %v1212_v57 }
 0x41d   : > { %1266 = vst [vmem:[%s3702_s24 + $0x60] sm:$0xff] %v1249_v61  ;;  %v1221_v63 = vpack.c.bf16 %v1204_v31, %v1201_v42  ;;  %v1250_v40 = vmul.f32 %v3693_v5, %v1204_v31 }
 0x41e   : > { %1234 = vst [vmem:[%s3708_s28 + $0x38] sm:$0xff] %v1222_v38  ;;  %1269 = vst [vmem:[%s3702_s24 + $0x78] sm:$0xff] %v1252_v62 }
 0x41f   : > { %1233 = vst [vmem:[%s3708_s28 + $0x30] sm:$0xff] %v1221_v63  ;;  %1267 = vst [vmem:[%s3702_s24 + $0x68] sm:$0xff] %v1250_v40 }
 0x420 PF: > { %s4207_s9 = sld [smem:[#allocation24_spill]] }
 0x426   : > { %p2114_p12 = scmp.le.s32.totalorder %s4207_s9, 0 }
 0x427   : > { %s4208_s15 = sld [smem:[#allocation24_spill]] (!%p2114_p12)  ;;  %v3758_v1 = vld [vmem:[%s3358_s29] sm:$0xff] (!%p2114_p12)  ;;  %v3761_v2 = vld [vmem:[%s3358_s29 + $0x8] sm:$0xff] (!%p2114_p12)  ;;  %v3764_v45 = vld [vmem:[%s3358_s29 + $0x10] sm:$0xff] (!%p2114_p12) }
 0x428   : > { %1273 = sbr.rel (%p2114_p12) target bundleno = 1635 (0x663), region = 84  ;;  %v3768_v48 = vld [vmem:[%s3358_s29 + $0x18] sm:$0xff] (!%p2114_p12)  ;;  %v3771_v6 = vld [vmem:[%s3358_s29 + $0x20] sm:$0xff] (!%p2114_p12)  ;;  %v3774_v7 = vld [vmem:[%s3358_s29 + $0x28] sm:$0xff] (!%p2114_p12) }
 0x429   : > { %v3777_v16 = vld [vmem:[%s3358_s29 + $0x30] sm:$0xff] (!%p2114_p12)  ;;  %v3780_v52 = vld [vmem:[%s3358_s29 + $0x38] sm:$0xff] (!%p2114_p12)  ;;  %v3783_v5 = vld [vmem:[%s3358_s29 + $0x40] sm:$0xff] (!%p2114_p12) }
 0x42a   : > { %v3786_v30 = vld [vmem:[%s3358_s29 + $0x48] sm:$0xff] (!%p2114_p12)  ;;  %v3789_v8 = vld [vmem:[%s3358_s29 + $0x50] sm:$0xff] (!%p2114_p12)  ;;  %v3792_v58 = vld [vmem:[%s3358_s29 + $0x58] sm:$0xff] (!%p2114_p12) }
 0x42b   : > { %v3795_v44 = vld [vmem:[%s3358_s29 + $0x60] sm:$0xff] (!%p2114_p12)  ;;  %v3798_v46 = vld [vmem:[%s3358_s29 + $0x68] sm:$0xff] (!%p2114_p12)  ;;  %v3801_v56 = vld [vmem:[%s3358_s29 + $0x70] sm:$0xff] (!%p2114_p12) }
 0x42c   : > { %v3804_v11 = vld [vmem:[%s3358_s29 + $0x78] sm:$0xff] (!%p2114_p12) }
 0x42d   : > { %s1290_s2 = sand.u32 (!%p2114_p12), 1, %s4208_s15 }
 0x42e   : > { %p2115_p0 = scmp.ne.s32.totalorder (!%p2114_p12), %s1290_s2, 1 }
 0x42f   : > { %v1303_v12 = vld [vmem:[#allocation2 + $0x40] sm:$0xff] (!%p2115_p0)  ;;  %v1304_v19 = vld [vmem:[#allocation2 + $0x48] sm:$0xff] (!%p2115_p0)  ;;  %v2117_v51 = vcombine.high (!%p2115_p0), %v3758_v1, %v3761_v2  ;;  %v2125_v20 = vcombine.high (!%p2115_p0), %v3783_v5, %v3786_v30  ;;  %v1305_v59 = vld [vmem:[#allocation2 + $0x50] sm:$0xff] (!%p2115_p0)  ;;  %v2116_v37 = vcombine.low (!%p2115_p0), %v3758_v1, %v3761_v2  ;;  %v2124_v39 = vcombine.low (!%p2115_p0), %v3783_v5, %v3786_v30  ;;  %s4209_s29 = sld [smem:[#allocation24_spill]] (!%p2115_p0)  ;;  %s1496_s0 = sshra.s32 (!%p2115_p0), %s3366_s30, 4 }
 0x430   : > { %1294 = sbr.rel (%p2115_p0) target bundleno = 1351 (0x547), region = 88  ;;  %v1295_v17 = vld [vmem:[#allocation2] sm:$0xff] (!%p2115_p0)  ;;  %2193 = vmatprep.subr.bf16.mxu0 (!%p2115_p0), %v1303_v12  ;;  %2385 = vmatprep.subr.bf16.mxu1 (!%p2115_p0), %v1303_v12  ;;  %v1296_v21 = vld [vmem:[#allocation2 + $0x8] sm:$0xff] (!%p2115_p0)  ;;  %v1297_v25 = vld [vmem:[#allocation2 + $0x10] sm:$0xff] (!%p2115_p0)  ;;  %v2119_v55 = vcombine.high (!%p2115_p0), %v3764_v45, %v3768_v48  ;;  %v2127_v10 = vcombine.high (!%p2115_p0), %v3789_v8, %v3792_v58  ;;  %v2118_v9 = vcombine.low (!%p2115_p0), %v3764_v45, %v3768_v48  ;;  %s2132_s27 = sshll.u32 (!%p2115_p0), %s1496_s0, 3 }
 0x431   : > { %2194 = vmatpush3.bf16.msra.mxu0 (!%p2115_p0), %v1295_v17  ;;  %2393 = vmatpush3.bf16.msra.mxu1 (!%p2115_p0), %v1295_v17  ;;  %v1306_v24 = vld [vmem:[#allocation2 + $0x58] sm:$0xff] (!%p2115_p0)  ;;  %v1307_v26 = vld [vmem:[#allocation2 + $0x60] sm:$0xff] (!%p2115_p0)  ;;  %v1308_v0 = vld [vmem:[#allocation2 + $0x68] sm:$0xff] (!%p2115_p0)  ;;  %v2126_v35 = vcombine.low (!%p2115_p0), %v3789_v8, %v3792_v58  ;;  %v2121_v14 = vcombine.high (!%p2115_p0), %v3771_v6, %v3774_v7  ;;  %v2129_v60 = vcombine.high (!%p2115_p0), %v3795_v44, %v3798_v46  ;;  %s3845_s3 = scalar_lea.vmem (!%p2115_p0), [#allocation4], %s3366_s30  ;;  %s3857_s25 = scalar_lea.vmem (!%p2115_p0), [#allocation3], %s2132_s27 }
 0x432   : > { %2195 = vmatprep.subr.bf16.mxu0 (!%p2115_p0), %v1304_v19  ;;  %2386 = vmatprep.subr.bf16.mxu1 (!%p2115_p0), %v1304_v19  ;;  %v1298_v50 = vld [vmem:[#allocation2 + $0x18] sm:$0xff] (!%p2115_p0)  ;;  %v1299_v28 = vld [vmem:[#allocation2 + $0x20] sm:$0xff] (!%p2115_p0)  ;;  %v1300_v29 = vld [vmem:[#allocation2 + $0x28] sm:$0xff] (!%p2115_p0)  ;;  %v2120_v43 = vcombine.low (!%p2115_p0), %v3771_v6, %v3774_v7  ;;  %v2128_v18 = vcombine.low (!%p2115_p0), %v3795_v44, %v3798_v46  ;;  %v2123_v36 = vcombine.high (!%p2115_p0), %v3777_v16, %v3780_v52 }
 0x433   : > { %1423 = vmatprep.mubr.bf16.mxu0 (!%p2115_p0), %v2117_v51  ;;  %1455 = vmatprep.mubr.bf16.mxu1 (!%p2115_p0), %v2125_v20  ;;  %v1309_v3 = vld [vmem:[#allocation2 + $0x70] sm:$0xff] (!%p2115_p0)  ;;  %v1310_v4 = vld [vmem:[#allocation2 + $0x78] sm:$0xff] (!%p2115_p0)  ;;  %v2131_v49 = vcombine.high (!%p2115_p0), %v3801_v56, %v3804_v11  ;;  %v2122_v13 = vcombine.low (!%p2115_p0), %v3777_v16, %v3780_v52  ;;  %v2130_v22 = vcombine.low (!%p2115_p0), %v3801_v56, %v3804_v11  ;;  %v1509_v33 = vld [vmem:[%s3845_s3] sm:$0xff] (!%p2115_p0) }
 0x434   : > { %v1301_v32 = vld [vmem:[#allocation2 + $0x30] sm:$0xff] (!%p2115_p0)  ;;  %v1302_v34 = vld [vmem:[#allocation2 + $0x38] sm:$0xff] (!%p2115_p0)  ;;  %v1517_v61 = vld [vmem:[%s3845_s3 + $0x40] sm:$0xff] (!%p2115_p0) }
 0x435   : > { %2196 = vmatpush3.bf16.msra.mxu0 (!%p2115_p0), %v1296_v21  ;;  %2394 = vmatpush3.bf16.msra.mxu1 (!%p2115_p0), %v1296_v21  ;;  %s1525_s7 = sld [smem:[#allocation5 + %s4209_s29]] (!%p2115_p0)  ;;  %v1510_v17 = vld [vmem:[%s3845_s3 + $0x8] sm:$0xff] (!%p2115_p0) }
 0x436   : > { %2197 = vmatprep.subr.bf16.mxu0 (!%p2115_p0), %v1305_v59  ;;  %2387 = vmatprep.subr.bf16.mxu1 (!%p2115_p0), %v1305_v59  ;;  %v1518_v59 = vld [vmem:[%s3845_s3 + $0x48] sm:$0xff] (!%p2115_p0) }
 0x439   : > { %2198 = vmatpush3.bf16.msra.mxu0 %v1297_v25  ;;  %2395 = vmatpush3.bf16.msra.mxu1 %v1297_v25 }
 0x43a   : > { %2199 = vmatprep.subr.bf16.mxu0 %v1306_v24  ;;  %2388 = vmatprep.subr.bf16.mxu1 %v1306_v24 }
 0x43b   : > { %v3842_v27 = vstv %s1525_s7 }
 0x43d   : > { %2200 = vmatpush3.bf16.msra.mxu0 %v1298_v50  ;;  %2396 = vmatpush3.bf16.msra.mxu1 %v1298_v50 }
 0x43e   : > { %2201 = vmatprep.subr.bf16.mxu0 %v1307_v26  ;;  %2389 = vmatprep.subr.bf16.mxu1 %v1307_v26 }
 0x441   : > { %2202 = vmatpush3.bf16.msra.mxu0 %v1299_v28  ;;  %2397 = vmatpush3.bf16.msra.mxu1 %v1299_v28 }
 0x442   : > { %2203 = vmatprep.subr.bf16.mxu0 %v1308_v0  ;;  %2390 = vmatprep.subr.bf16.mxu1 %v1308_v0 }
 0x445   : > { %2204 = vmatpush3.bf16.msra.mxu0 %v1300_v29  ;;  %2398 = vmatpush3.bf16.msra.mxu1 %v1300_v29 }
 0x446   : > { %2205 = vmatprep.subr.bf16.mxu0 %v1309_v3  ;;  %2391 = vmatprep.subr.bf16.mxu1 %v1309_v3 }
 0x449   : > { %2206 = vmatpush3.bf16.msra.mxu0 %v1301_v32  ;;  %2399 = vmatpush3.bf16.msra.mxu1 %v1301_v32 }
 0x44a   : > { %2207 = vmatprep.subr.bf16.mxu0 %v1310_v4  ;;  %2392 = vmatprep.subr.bf16.mxu1 %v1310_v4 }
 0x44d   : > { %2208 = vmatpush3.bf16.msra.mxu0 %v1302_v34  ;;  %2400 = vmatpush3.bf16.msra.mxu1 %v1302_v34 }
 0x450   : > { %1424 = vmatmul.mubr.bf16.vlgmr.msra.gmra.mrb[0].mxu0 %v2116_v37  ;;  %1456 = vmatmul.mubr.bf16.vlgmr.msra.gmra.mrb[0].mxu1 %v2124_v39  ;;  %v1511_v39 = vld [vmem:[%s3845_s3 + $0x10] sm:$0xff] }
 0x451   : > { %1431 = vmatprep.mubr.bf16.mxu0 %v2119_v55  ;;  %1463 = vmatprep.mubr.bf16.mxu1 %v2127_v10  ;;  %v1519_v55 = vld [vmem:[%s3845_s3 + $0x50] sm:$0xff] }
 0x458   : > { %1432 = vmatmul.mubr.bf16.gmra.mrb[4].mxu0 %v2118_v9  ;;  %1464 = vmatmul.mubr.bf16.gmra.mrb[4].mxu1 %v2126_v35 }
 0x459   : > { %1439 = vmatprep.mubr.bf16.mxu0 %v2121_v14  ;;  %1471 = vmatprep.mubr.bf16.mxu1 %v2129_v60 }
 0x460   : > { %1440 = vmatmul.mubr.bf16.gmra.mrb[8].mxu0 %v2120_v43  ;;  %1472 = vmatmul.mubr.bf16.gmra.mrb[8].mxu1 %v2128_v18  ;;  %v1512_v18 = vld [vmem:[%s3845_s3 + $0x18] sm:$0xff] }
 0x461   : > { %1447 = vmatprep.mubr.bf16.mxu0 %v2123_v36  ;;  %1479 = vmatprep.mubr.bf16.mxu1 %v2131_v49 }
 0x468   : > { %1448 = vmatmul.mubr.bf16.gmra.mrb[12].mxu0 %v2122_v13  ;;  %1480 = vmatmul.mubr.bf16.gmra.mrb[12].mxu1 %v2130_v22 }
 0x523   : > { %v2209_v23 = vpop.f32.mrb[0].mxu0  ;;  %v2233_v47 = vpop.f32.mrb[0].mxu1 }
 0x524   : > { %v2210_v15 = vpop.f32.mrb[1].mxu0  ;;  %v2234_v54 = vpop.f32.mrb[1].mxu1 }
 0x525   : > { %v2211_v42 = vadd.f32 %v2210_v15, %v2209_v23  ;;  %v2235_v53 = vadd.f32 %v2234_v54, %v2233_v47  ;;  %v2212_v41 = vpop.f32.mrb[2].mxu0  ;;  %v2236_v57 = vpop.f32.mrb[2].mxu1  ;;  %v1520_v23 = vld [vmem:[%s3845_s3 + $0x58] sm:$0xff] }
 0x526   : > { %v2213_v31 = vpop.f32.mrb[3].mxu0  ;;  %v2237_v38 = vpop.f32.mrb[3].mxu1 }
 0x527   : > { %v1527_v62 = vmul.f32 %v2211_v42, %v3842_v27  ;;  %v1535_v63 = vmul.f32 %v2235_v53, %v3842_v27  ;;  %v2214_v40 = vadd.f32 %v2213_v31, %v2212_v41  ;;  %v2238_v12 = vadd.f32 %v2237_v38, %v2236_v57 }
 0x529   : > { %v1543_v19 = vadd.f32 %v1527_v62, %v1509_v33  ;;  %v1551_v51 = vadd.f32 %v1535_v63, %v1517_v61  ;;  %v1488_v20 = vpack.c.bf16 %v2214_v40, %v2211_v42  ;;  %v1528_v21 = vmul.f32 %v2214_v40, %v3842_v27  ;;  %v1513_v63 = vld [vmem:[%s3845_s3 + $0x20] sm:$0xff] }
 0x52a   : > { %v1492_v25 = vpack.c.bf16 %v2238_v12, %v2235_v53  ;;  %v1536_v24 = vmul.f32 %v2238_v12, %v3842_v27  ;;  %v1521_v40 = vld [vmem:[%s3845_s3 + $0x60] sm:$0xff] }
 0x52b   : > { %1559 = vst [vmem:[%s3845_s3] sm:$0xff] %v1543_v19  ;;  %1567 = vst [vmem:[%s3845_s3 + $0x40] sm:$0xff] %v1551_v51  ;;  %v1544_v50 = vadd.f32 %v1528_v21, %v1510_v17  ;;  %v2215_v26 = vpop.f32.mrb[4].mxu0  ;;  %v2239_v28 = vpop.f32.mrb[4].mxu1 }
 0x52c   : > { %1500 = vst [vmem:[%s3857_s25] sm:$0xff] %v1488_v20  ;;  %1504 = vst [vmem:[%s3857_s25 + $0x20] sm:$0xff] %v1492_v25  ;;  %v1552_v0 = vadd.f32 %v1536_v24, %v1518_v59  ;;  %v2216_v29 = vpop.f32.mrb[5].mxu0  ;;  %v2240_v3 = vpop.f32.mrb[5].mxu1  ;;  %v1514_v59 = vld [vmem:[%s3845_s3 + $0x28] sm:$0xff] }
 0x52d   : > { %1560 = vst [vmem:[%s3845_s3 + $0x8] sm:$0xff] %v1544_v50  ;;  %v2217_v32 = vadd.f32 %v2216_v29, %v2215_v26  ;;  %v2241_v4 = vadd.f32 %v2240_v3, %v2239_v28  ;;  %v2218_v34 = vpop.f32.mrb[6].mxu0  ;;  %v2242_v37 = vpop.f32.mrb[6].mxu1  ;;  %v1522_v28 = vld [vmem:[%s3845_s3 + $0x68] sm:$0xff] }
 0x52e   : > { %1568 = vst [vmem:[%s3845_s3 + $0x48] sm:$0xff] %v1552_v0  ;;  %v2219_v10 = vpop.f32.mrb[7].mxu0  ;;  %v2243_v9 = vpop.f32.mrb[7].mxu1 }
 0x52f   : > { %v1529_v35 = vmul.f32 %v2217_v32, %v3842_v27  ;;  %v1537_v14 = vmul.f32 %v2241_v4, %v3842_v27  ;;  %v2220_v60 = vadd.f32 %v2219_v10, %v2218_v34  ;;  %v2244_v43 = vadd.f32 %v2243_v9, %v2242_v37 }
 0x531   : > { %v1545_v36 = vadd.f32 %v1529_v35, %v1511_v39  ;;  %v1553_v49 = vadd.f32 %v1537_v14, %v1519_v55  ;;  %v1489_v13 = vpack.c.bf16 %v2220_v60, %v2217_v32  ;;  %v1530_v22 = vmul.f32 %v2220_v60, %v3842_v27  ;;  %v1515_v14 = vld [vmem:[%s3845_s3 + $0x30] sm:$0xff] }
 0x532   : > { %v1493_v47 = vpack.c.bf16 %v2244_v43, %v2241_v4  ;;  %v1538_v15 = vmul.f32 %v2244_v43, %v3842_v27  ;;  %v1523_v60 = vld [vmem:[%s3845_s3 + $0x70] sm:$0xff] }
 0x533   : > { %1561 = vst [vmem:[%s3845_s3 + $0x10] sm:$0xff] %v1545_v36  ;;  %1569 = vst [vmem:[%s3845_s3 + $0x50] sm:$0xff] %v1553_v49  ;;  %v1546_v54 = vadd.f32 %v1530_v22, %v1512_v18  ;;  %v2221_v42 = vpop.f32.mrb[8].mxu0  ;;  %v2245_v53 = vpop.f32.mrb[8].mxu1 }
 0x534   : > { %1501 = vst [vmem:[%s3857_s25 + $0x8] sm:$0xff] %v1489_v13  ;;  %1505 = vst [vmem:[%s3857_s25 + $0x28] sm:$0xff] %v1493_v47  ;;  %v1554_v41 = vadd.f32 %v1538_v15, %v1520_v23  ;;  %v2222_v57 = vpop.f32.mrb[9].mxu0  ;;  %v2246_v33 = vpop.f32.mrb[9].mxu1  ;;  %v1516_v23 = vld [vmem:[%s3845_s3 + $0x38] sm:$0xff] }
 0x535   : > { %1562 = vst [vmem:[%s3845_s3 + $0x18] sm:$0xff] %v1546_v54  ;;  %v2223_v61 = vadd.f32 %v2222_v57, %v2221_v42  ;;  %v2247_v31 = vadd.f32 %v2246_v33, %v2245_v53  ;;  %v2224_v38 = vpop.f32.mrb[10].mxu0  ;;  %v2248_v62 = vpop.f32.mrb[10].mxu1  ;;  %v1524_v53 = vld [vmem:[%s3845_s3 + $0x78] sm:$0xff] }
 0x536   : > { %1570 = vst [vmem:[%s3845_s3 + $0x58] sm:$0xff] %v1554_v41  ;;  %v2225_v12 = vpop.f32.mrb[11].mxu0  ;;  %v2249_v17 = vpop.f32.mrb[11].mxu1 }
 0x537   : > { %v1531_v19 = vmul.f32 %v2223_v61, %v3842_v27  ;;  %v1539_v51 = vmul.f32 %v2247_v31, %v3842_v27  ;;  %v2226_v20 = vadd.f32 %v2225_v12, %v2224_v38  ;;  %v2250_v21 = vadd.f32 %v2249_v17, %v2248_v62 }
 0x539   : > { %v1547_v25 = vadd.f32 %v1531_v19, %v1513_v63  ;;  %v1555_v24 = vadd.f32 %v1539_v51, %v1521_v40  ;;  %v1490_v50 = vpack.c.bf16 %v2226_v20, %v2223_v61  ;;  %v1532_v26 = vmul.f32 %v2226_v20, %v3842_v27 }
 0x53a   : > { %v1494_v0 = vpack.c.bf16 %v2250_v21, %v2247_v31  ;;  %v1540_v29 = vmul.f32 %v2250_v21, %v3842_v27 }
 0x53b   : > { %1563 = vst [vmem:[%s3845_s3 + $0x20] sm:$0xff] %v1547_v25  ;;  %1571 = vst [vmem:[%s3845_s3 + $0x60] sm:$0xff] %v1555_v24  ;;  %v1548_v3 = vadd.f32 %v1532_v26, %v1514_v59  ;;  %v2227_v32 = vpop.f32.mrb[12].mxu0  ;;  %v2251_v4 = vpop.f32.mrb[12].mxu1 }
 0x53c   : > { %1502 = vst [vmem:[%s3857_s25 + $0x10] sm:$0xff] %v1490_v50  ;;  %1506 = vst [vmem:[%s3857_s25 + $0x30] sm:$0xff] %v1494_v0  ;;  %v1556_v34 = vadd.f32 %v1540_v29, %v1522_v28  ;;  %v2228_v37 = vpop.f32.mrb[13].mxu0  ;;  %v2252_v39 = vpop.f32.mrb[13].mxu1 }
 0x53d   : > { %1564 = vst [vmem:[%s3845_s3 + $0x28] sm:$0xff] %v1548_v3  ;;  %v2229_v55 = vadd.f32 %v2228_v37, %v2227_v32  ;;  %v2253_v10 = vadd.f32 %v2252_v39, %v2251_v4  ;;  %v2230_v9 = vpop.f32.mrb[14].mxu0  ;;  %v2254_v35 = vpop.f32.mrb[14].mxu1 }
 0x53e   : > { %1572 = vst [vmem:[%s3845_s3 + $0x68] sm:$0xff] %v1556_v34  ;;  %v2231_v43 = vpop.f32.mrb[15].mxu0  ;;  %v2255_v18 = vpop.f32.mrb[15].mxu1 }
 0x53f   : > { %v1533_v36 = vmul.f32 %v2229_v55, %v3842_v27  ;;  %v1541_v49 = vmul.f32 %v2253_v10, %v3842_v27  ;;  %v2232_v13 = vadd.f32 %v2231_v43, %v2230_v9  ;;  %v2256_v22 = vadd.f32 %v2255_v18, %v2254_v35 }
 0x541   : > { %v1549_v47 = vadd.f32 %v1533_v36, %v1515_v14  ;;  %v1557_v15 = vadd.f32 %v1541_v49, %v1523_v60  ;;  %v1491_v54 = vpack.c.bf16 %v2232_v13, %v2229_v55  ;;  %v1534_v42 = vmul.f32 %v2232_v13, %v3842_v27 }
 0x542   : > { %v1495_v41 = vpack.c.bf16 %v2256_v22, %v2253_v10  ;;  %v1542_v57 = vmul.f32 %v2256_v22, %v3842_v27 }
 0x543   : > { %1565 = vst [vmem:[%s3845_s3 + $0x30] sm:$0xff] %v1549_v47  ;;  %1573 = vst [vmem:[%s3845_s3 + $0x70] sm:$0xff] %v1557_v15  ;;  %v1550_v33 = vadd.f32 %v1534_v42, %v1516_v23 }
 0x544   : > { %1503 = vst [vmem:[%s3857_s25 + $0x18] sm:$0xff] %v1491_v54  ;;  %1507 = vst [vmem:[%s3857_s25 + $0x38] sm:$0xff] %v1495_v41  ;;  %v1558_v61 = vadd.f32 %v1542_v57, %v1524_v53 }
 0x545   : > { %1566 = vst [vmem:[%s3845_s3 + $0x38] sm:$0xff] %v1550_v33 }
 0x546   : > { %1574 = vst [vmem:[%s3845_s3 + $0x78] sm:$0xff] %v1558_v61 }
 0x547 PF: > { %p2133_p9 = scmp.ne.s32.totalorder %s1290_s2, 0 }
 0x548   : > { %v2135_v63 = vcombine.high (!%p2133_p9), %v3758_v1, %v3761_v2  ;;  %v2143_v27 = vcombine.high (!%p2133_p9), %v3783_v5, %v3786_v30  ;;  %v2134_v0 = vcombine.low (!%p2133_p9), %v3758_v1, %v3761_v2  ;;  %v2142_v29 = vcombine.low (!%p2133_p9), %v3783_v5, %v3786_v30  ;;  %s4211_s5 = sld [smem:[#allocation24_spill]] (!%p2133_p9)  ;;  %s1780_s24 = sshra.s32 (!%p2133_p9), %s3366_s30, 4 }
 0x549   : > { %1578 = sbr.rel (%p2133_p9) target bundleno = 1635 (0x663), region = 92  ;;  %v2137_v3 = vcombine.high (!%p2133_p9), %v3764_v45, %v3768_v48  ;;  %v2145_v32 = vcombine.high (!%p2133_p9), %v3789_v8, %v3792_v58  ;;  %v2136_v4 = vcombine.low (!%p2133_p9), %v3764_v45, %v3768_v48  ;;  %v2144_v1 = vcombine.low (!%p2133_p9), %v3789_v8, %v3792_v58  ;;  %s2150_s28 = sshll.u32 (!%p2133_p9), %s1780_s24, 3 }
 0x54a   : > { %1707 = vmatprep.mubr.bf16.mxu0 (!%p2133_p9), %v2135_v63  ;;  %1739 = vmatprep.mubr.bf16.mxu1 (!%p2133_p9), %v2143_v27  ;;  %v2139_v2 = vcombine.high (!%p2133_p9), %v3771_v6, %v3774_v7  ;;  %v2147_v5 = vcombine.high (!%p2133_p9), %v3795_v44, %v3798_v46  ;;  %v2138_v30 = vcombine.low (!%p2133_p9), %v3771_v6, %v3774_v7  ;;  %s3944_s9 = scalar_lea.vmem (!%p2133_p9), [#allocation4], %s3366_s30  ;;  %s3956_s15 = scalar_lea.vmem (!%p2133_p9), [#allocation2], %s2150_s28 }
 0x54b   : > { %v1587_v31 = vld [vmem:[#allocation3 + $0x40] sm:$0xff] (!%p2133_p9)  ;;  %v1588_v62 = vld [vmem:[#allocation3 + $0x48] sm:$0xff] (!%p2133_p9)  ;;  %v1589_v12 = vld [vmem:[#allocation3 + $0x50] sm:$0xff] (!%p2133_p9)  ;;  %v2146_v45 = vcombine.low (!%p2133_p9), %v3795_v44, %v3798_v46  ;;  %v2141_v48 = vcombine.high (!%p2133_p9), %v3777_v16, %v3780_v52  ;;  %v2149_v8 = vcombine.high (!%p2133_p9), %v3801_v56, %v3804_v11  ;;  %v2140_v58 = vcombine.low (!%p2133_p9), %v3777_v16, %v3780_v52 }
 0x54c   : > { %v1579_v38 = vld [vmem:[#allocation3] sm:$0xff] (!%p2133_p9)  ;;  %2257 = vmatprep.subr.bf16.mxu0 (!%p2133_p9), %v1587_v31  ;;  %2401 = vmatprep.subr.bf16.mxu1 (!%p2133_p9), %v1587_v31  ;;  %v1580_v40 = vld [vmem:[#allocation3 + $0x8] sm:$0xff] (!%p2133_p9)  ;;  %v1581_v17 = vld [vmem:[#allocation3 + $0x10] sm:$0xff] (!%p2133_p9)  ;;  %v2148_v6 = vcombine.low (!%p2133_p9), %v3801_v56, %v3804_v11 }
 0x54d   : > { %2258 = vmatpush3.bf16.msra.mxu0 (!%p2133_p9), %v1579_v38  ;;  %2409 = vmatpush3.bf16.msra.mxu1 (!%p2133_p9), %v1579_v38  ;;  %v1590_v19 = vld [vmem:[#allocation3 + $0x58] sm:$0xff] (!%p2133_p9)  ;;  %v1591_v20 = vld [vmem:[#allocation3 + $0x60] sm:$0xff] (!%p2133_p9)  ;;  %v1592_v59 = vld [vmem:[#allocation3 + $0x68] sm:$0xff] (!%p2133_p9) }
 0x54e   : > { %2259 = vmatprep.subr.bf16.mxu0 (!%p2133_p9), %v1588_v62  ;;  %2402 = vmatprep.subr.bf16.mxu1 (!%p2133_p9), %v1588_v62  ;;  %v1582_v51 = vld [vmem:[#allocation3 + $0x18] sm:$0xff] (!%p2133_p9)  ;;  %v1583_v21 = vld [vmem:[#allocation3 + $0x20] sm:$0xff] (!%p2133_p9)  ;;  %v1584_v25 = vld [vmem:[#allocation3 + $0x28] sm:$0xff] (!%p2133_p9)  ;;  %s1809_s12 = sld [smem:[#allocation5 + %s4211_s5]] (!%p2133_p9) }
 0x54f   : > { %v1593_v24 = vld [vmem:[#allocation3 + $0x70] sm:$0xff] (!%p2133_p9)  ;;  %v1594_v26 = vld [vmem:[#allocation3 + $0x78] sm:$0xff] (!%p2133_p9)  ;;  %v1793_v16 = vld [vmem:[%s3944_s9] sm:$0xff] (!%p2133_p9) }
 0x550   : > { %v1585_v50 = vld [vmem:[#allocation3 + $0x30] sm:$0xff]  ;;  %v1586_v28 = vld [vmem:[#allocation3 + $0x38] sm:$0xff]  ;;  %v1801_v52 = vld [vmem:[%s3944_s9 + $0x40] sm:$0xff] }
 0x551   : > { %2260 = vmatpush3.bf16.msra.mxu0 %v1580_v40  ;;  %2410 = vmatpush3.bf16.msra.mxu1 %v1580_v40  ;;  %v1794_v18 = vld [vmem:[%s3944_s9 + $0x8] sm:$0xff]  ;;  %v1795_v63 = vld [vmem:[%s3944_s9 + $0x10] sm:$0xff] }
 0x552   : > { %2261 = vmatprep.subr.bf16.mxu0 %v1589_v12  ;;  %2403 = vmatprep.subr.bf16.mxu1 %v1589_v12  ;;  %v1802_v23 = vld [vmem:[%s3944_s9 + $0x48] sm:$0xff]  ;;  %v1803_v27 = vld [vmem:[%s3944_s9 + $0x50] sm:$0xff] }
 0x554   : > { %v3941_v34 = vstv %s1809_s12 }
 0x555   : > { %2262 = vmatpush3.bf16.msra.mxu0 %v1581_v17  ;;  %2411 = vmatpush3.bf16.msra.mxu1 %v1581_v17 }
 0x556   : > { %2263 = vmatprep.subr.bf16.mxu0 %v1590_v19  ;;  %2404 = vmatprep.subr.bf16.mxu1 %v1590_v19 }
 0x559   : > { %2264 = vmatpush3.bf16.msra.mxu0 %v1582_v51  ;;  %2412 = vmatpush3.bf16.msra.mxu1 %v1582_v51 }
 0x55a   : > { %2265 = vmatprep.subr.bf16.mxu0 %v1591_v20  ;;  %2405 = vmatprep.subr.bf16.mxu1 %v1591_v20 }
 0x55d   : > { %2266 = vmatpush3.bf16.msra.mxu0 %v1583_v21  ;;  %2413 = vmatpush3.bf16.msra.mxu1 %v1583_v21  ;;  %v1796_v21 = vld [vmem:[%s3944_s9 + $0x18] sm:$0xff] }
 0x55e   : > { %2267 = vmatprep.subr.bf16.mxu0 %v1592_v59  ;;  %2406 = vmatprep.subr.bf16.mxu1 %v1592_v59 }
 0x561   : > { %2268 = vmatpush3.bf16.msra.mxu0 %v1584_v25  ;;  %2414 = vmatpush3.bf16.msra.mxu1 %v1584_v25 }
 0x562   : > { %2269 = vmatprep.subr.bf16.mxu0 %v1593_v24  ;;  %2407 = vmatprep.subr.bf16.mxu1 %v1593_v24 }
 0x565   : > { %2270 = vmatpush3.bf16.msra.mxu0 %v1585_v50  ;;  %2415 = vmatpush3.bf16.msra.mxu1 %v1585_v50 }
 0x566   : > { %2271 = vmatprep.subr.bf16.mxu0 %v1594_v26  ;;  %2408 = vmatprep.subr.bf16.mxu1 %v1594_v26  ;;  %v1804_v26 = vld [vmem:[%s3944_s9 + $0x58] sm:$0xff] }
 0x569   : > { %2272 = vmatpush3.bf16.msra.mxu0 %v1586_v28  ;;  %2416 = vmatpush3.bf16.msra.mxu1 %v1586_v28 }
 0x56c   : > { %1708 = vmatmul.mubr.bf16.vlgmr.msra.gmra.mrb[0].mxu0 %v2134_v0  ;;  %1740 = vmatmul.mubr.bf16.vlgmr.msra.gmra.mrb[0].mxu1 %v2142_v29 }
 0x56d   : > { %1715 = vmatprep.mubr.bf16.mxu0 %v2137_v3  ;;  %1747 = vmatprep.mubr.bf16.mxu1 %v2145_v32 }
 0x574   : > { %1716 = vmatmul.mubr.bf16.gmra.mrb[4].mxu0 %v2136_v4  ;;  %1748 = vmatmul.mubr.bf16.gmra.mrb[4].mxu1 %v2144_v1 }
 0x575   : > { %1723 = vmatprep.mubr.bf16.mxu0 %v2139_v2  ;;  %1755 = vmatprep.mubr.bf16.mxu1 %v2147_v5 }
 0x57c   : > { %1724 = vmatmul.mubr.bf16.gmra.mrb[8].mxu0 %v2138_v30  ;;  %1756 = vmatmul.mubr.bf16.gmra.mrb[8].mxu1 %v2146_v45 }
 0x57d   : > { %1731 = vmatprep.mubr.bf16.mxu0 %v2141_v48  ;;  %1763 = vmatprep.mubr.bf16.mxu1 %v2149_v8  ;;  %v1797_v8 = vld [vmem:[%s3944_s9 + $0x20] sm:$0xff] }
 0x584   : > { %1732 = vmatmul.mubr.bf16.gmra.mrb[12].mxu0 %v2140_v58  ;;  %1764 = vmatmul.mubr.bf16.gmra.mrb[12].mxu1 %v2148_v6  ;;  %v1805_v58 = vld [vmem:[%s3944_s9 + $0x60] sm:$0xff] }
 0x63f   : > { %v2273_v7 = vpop.f32.mrb[0].mxu0  ;;  %v2297_v44 = vpop.f32.mrb[0].mxu1 }
 0x640   : > { %v2274_v46 = vpop.f32.mrb[1].mxu0  ;;  %v2298_v37 = vpop.f32.mrb[1].mxu1 }
 0x641   : > { %v2275_v39 = vadd.f32 %v2274_v46, %v2273_v7  ;;  %v2299_v55 = vadd.f32 %v2298_v37, %v2297_v44  ;;  %v2276_v10 = vpop.f32.mrb[2].mxu0  ;;  %v2300_v9 = vpop.f32.mrb[2].mxu1 }
 0x642   : > { %v2277_v56 = vpop.f32.mrb[3].mxu0  ;;  %v2301_v11 = vpop.f32.mrb[3].mxu1 }
 0x643   : > { %v1811_v35 = vmul.f32 %v2275_v39, %v3941_v34  ;;  %v1819_v14 = vmul.f32 %v2299_v55, %v3941_v34  ;;  %v2278_v60 = vadd.f32 %v2277_v56, %v2276_v10  ;;  %v2302_v43 = vadd.f32 %v2301_v11, %v2300_v9  ;;  %v1806_v56 = vld [vmem:[%s3944_s9 + $0x68] sm:$0xff] }
 0x645   : > { %v1827_v36 = vadd.f32 %v1811_v35, %v1793_v16  ;;  %v1835_v49 = vadd.f32 %v1819_v14, %v1801_v52  ;;  %v1772_v13 = vpack.c.bf16 %v2278_v60, %v2275_v39  ;;  %v1812_v22 = vmul.f32 %v2278_v60, %v3941_v34 }
 0x646   : > { %v1776_v47 = vpack.c.bf16 %v2302_v43, %v2299_v55  ;;  %v1820_v15 = vmul.f32 %v2302_v43, %v3941_v34  ;;  %v1798_v55 = vld [vmem:[%s3944_s9 + $0x28] sm:$0xff] }
 0x647   : > { %1843 = vst [vmem:[%s3944_s9] sm:$0xff] %v1827_v36  ;;  %1851 = vst [vmem:[%s3944_s9 + $0x40] sm:$0xff] %v1835_v49  ;;  %v1828_v54 = vadd.f32 %v1812_v22, %v1794_v18  ;;  %v2279_v42 = vpop.f32.mrb[4].mxu0  ;;  %v2303_v53 = vpop.f32.mrb[4].mxu1 }
 0x648   : > { %1784 = vst [vmem:[%s3956_s15] sm:$0xff] %v1772_v13  ;;  %1788 = vst [vmem:[%s3956_s15 + $0x20] sm:$0xff] %v1776_v47  ;;  %v1836_v41 = vadd.f32 %v1820_v15, %v1802_v23  ;;  %v2280_v57 = vpop.f32.mrb[5].mxu0  ;;  %v2304_v33 = vpop.f32.mrb[5].mxu1  ;;  %v1799_v15 = vld [vmem:[%s3944_s9 + $0x30] sm:$0xff] }
 0x649   : > { %1844 = vst [vmem:[%s3944_s9 + $0x8] sm:$0xff] %v1828_v54  ;;  %v2281_v61 = vadd.f32 %v2280_v57, %v2279_v42  ;;  %v2305_v31 = vadd.f32 %v2304_v33, %v2303_v53  ;;  %v2282_v38 = vpop.f32.mrb[6].mxu0  ;;  %v2306_v62 = vpop.f32.mrb[6].mxu1  ;;  %v1807_v54 = vld [vmem:[%s3944_s9 + $0x70] sm:$0xff] }
 0x64a   : > { %1852 = vst [vmem:[%s3944_s9 + $0x48] sm:$0xff] %v1836_v41  ;;  %v2283_v40 = vpop.f32.mrb[7].mxu0  ;;  %v2307_v12 = vpop.f32.mrb[7].mxu1 }
 0x64b   : > { %v1813_v17 = vmul.f32 %v2281_v61, %v3941_v34  ;;  %v1821_v19 = vmul.f32 %v2305_v31, %v3941_v34  ;;  %v2284_v51 = vadd.f32 %v2283_v40, %v2282_v38  ;;  %v2308_v20 = vadd.f32 %v2307_v12, %v2306_v62  ;;  %v1808_v40 = vld [vmem:[%s3944_s9 + $0x78] sm:$0xff] }
 0x64d   : > { %v1829_v59 = vadd.f32 %v1813_v17, %v1795_v63  ;;  %v1837_v25 = vadd.f32 %v1821_v19, %v1803_v27  ;;  %v1773_v24 = vpack.c.bf16 %v2284_v51, %v2281_v61  ;;  %v1814_v50 = vmul.f32 %v2284_v51, %v3941_v34 }
 0x64e   : > { %v1777_v28 = vpack.c.bf16 %v2308_v20, %v2305_v31  ;;  %v1822_v0 = vmul.f32 %v2308_v20, %v3941_v34  ;;  %v1800_v31 = vld [vmem:[%s3944_s9 + $0x38] sm:$0xff] }
 0x64f   : > { %1845 = vst [vmem:[%s3944_s9 + $0x10] sm:$0xff] %v1829_v59  ;;  %1853 = vst [vmem:[%s3944_s9 + $0x50] sm:$0xff] %v1837_v25  ;;  %v1830_v29 = vadd.f32 %v1814_v50, %v1796_v21  ;;  %v2285_v3 = vpop.f32.mrb[8].mxu0  ;;  %v2309_v32 = vpop.f32.mrb[8].mxu1 }
 0x650   : > { %1785 = vst [vmem:[%s3956_s15 + $0x8] sm:$0xff] %v1773_v24  ;;  %1789 = vst [vmem:[%s3956_s15 + $0x28] sm:$0xff] %v1777_v28  ;;  %v1838_v4 = vadd.f32 %v1822_v0, %v1804_v26  ;;  %v2286_v1 = vpop.f32.mrb[9].mxu0  ;;  %v2310_v2 = vpop.f32.mrb[9].mxu1 }
 0x651   : > { %1846 = vst [vmem:[%s3944_s9 + $0x18] sm:$0xff] %v1830_v29  ;;  %v2287_v5 = vadd.f32 %v2286_v1, %v2285_v3  ;;  %v2311_v30 = vadd.f32 %v2310_v2, %v2309_v32  ;;  %v2288_v45 = vpop.f32.mrb[10].mxu0  ;;  %v2312_v48 = vpop.f32.mrb[10].mxu1 }
 0x652   : > { %1854 = vst [vmem:[%s3944_s9 + $0x58] sm:$0xff] %v1838_v4  ;;  %v2289_v6 = vpop.f32.mrb[11].mxu0  ;;  %v2313_v7 = vpop.f32.mrb[11].mxu1 }
 0x653   : > { %v1815_v44 = vmul.f32 %v2287_v5, %v3941_v34  ;;  %v1823_v46 = vmul.f32 %v2311_v30, %v3941_v34  ;;  %v2290_v37 = vadd.f32 %v2289_v6, %v2288_v45  ;;  %v2314_v39 = vadd.f32 %v2313_v7, %v2312_v48 }
 0x655   : > { %v1831_v10 = vadd.f32 %v1815_v44, %v1797_v8  ;;  %v1839_v9 = vadd.f32 %v1823_v46, %v1805_v58  ;;  %v1774_v16 = vpack.c.bf16 %v2290_v37, %v2287_v5  ;;  %v1816_v52 = vmul.f32 %v2290_v37, %v3941_v34 }
 0x656   : > { %v1778_v11 = vpack.c.bf16 %v2314_v39, %v2311_v30  ;;  %v1824_v35 = vmul.f32 %v2314_v39, %v3941_v34 }
 0x657   : > { %1847 = vst [vmem:[%s3944_s9 + $0x20] sm:$0xff] %v1831_v10  ;;  %1855 = vst [vmem:[%s3944_s9 + $0x60] sm:$0xff] %v1839_v9  ;;  %v1832_v14 = vadd.f32 %v1816_v52, %v1798_v55  ;;  %v2291_v60 = vpop.f32.mrb[12].mxu0  ;;  %v2315_v43 = vpop.f32.mrb[12].mxu1 }
 0x658   : > { %1786 = vst [vmem:[%s3956_s15 + $0x10] sm:$0xff] %v1774_v16  ;;  %1790 = vst [vmem:[%s3956_s15 + $0x30] sm:$0xff] %v1778_v11  ;;  %v1840_v18 = vadd.f32 %v1824_v35, %v1806_v56  ;;  %v2292_v36 = vpop.f32.mrb[13].mxu0  ;;  %v2316_v49 = vpop.f32.mrb[13].mxu1 }
 0x659   : > { %1848 = vst [vmem:[%s3944_s9 + $0x28] sm:$0xff] %v1832_v14  ;;  %v2293_v13 = vadd.f32 %v2292_v36, %v2291_v60  ;;  %v2317_v22 = vadd.f32 %v2316_v49, %v2315_v43  ;;  %v2294_v23 = vpop.f32.mrb[14].mxu0  ;;  %v2318_v47 = vpop.f32.mrb[14].mxu1 }
 0x65a   : > { %1856 = vst [vmem:[%s3944_s9 + $0x68] sm:$0xff] %v1840_v18  ;;  %v2295_v42 = vpop.f32.mrb[15].mxu0  ;;  %v2319_v53 = vpop.f32.mrb[15].mxu1 }
 0x65b   : > { %v1817_v41 = vmul.f32 %v2293_v13, %v3941_v34  ;;  %v1825_v57 = vmul.f32 %v2317_v22, %v3941_v34  ;;  %v2296_v33 = vadd.f32 %v2295_v42, %v2294_v23  ;;  %v2320_v61 = vadd.f32 %v2319_v53, %v2318_v47 }
 0x65d   : > { %v1833_v38 = vadd.f32 %v1817_v41, %v1799_v15  ;;  %v1841_v62 = vadd.f32 %v1825_v57, %v1807_v54  ;;  %v1775_v63 = vpack.c.bf16 %v2296_v33, %v2293_v13  ;;  %v1818_v27 = vmul.f32 %v2296_v33, %v3941_v34 }
 0x65e   : > { %v1779_v12 = vpack.c.bf16 %v2320_v61, %v2317_v22  ;;  %v1826_v17 = vmul.f32 %v2320_v61, %v3941_v34 }
 0x65f   : > { %1849 = vst [vmem:[%s3944_s9 + $0x30] sm:$0xff] %v1833_v38  ;;  %1857 = vst [vmem:[%s3944_s9 + $0x70] sm:$0xff] %v1841_v62  ;;  %v1834_v19 = vadd.f32 %v1818_v27, %v1800_v31 }
 0x660   : > { %1787 = vst [vmem:[%s3956_s15 + $0x18] sm:$0xff] %v1775_v63  ;;  %1791 = vst [vmem:[%s3956_s15 + $0x38] sm:$0xff] %v1779_v12  ;;  %v1842_v51 = vadd.f32 %v1826_v17, %v1808_v40 }
 0x661   : > { %1850 = vst [vmem:[%s3944_s9 + $0x38] sm:$0xff] %v1834_v19 }
 0x662   : > { %1858 = vst [vmem:[%s3944_s9 + $0x78] sm:$0xff] %v1842_v51 }
 0x663 PF: > { %s4212_s2 = sld [smem:[#allocation24_spill]] }
 0x669   : > { %p2151_p6 = scmp.ne.s32.totalorder %s4212_s2, 2 }
 0x66a   : > { %s4006_s29 = scalar_lea.vmem (!%p2151_p6), [#allocation4], %s3366_s30 }
 0x66b   : > { %1862 = sbr.rel (%p2151_p6) target bundleno = 1652 (0x674), region = 96  ;;  %v1864_v34 = vld [vmem:[%s4006_s29] sm:$0xff] (!%p2151_p6)  ;;  %v1865_v20 = vld [vmem:[%s4006_s29 + $0x8] sm:$0xff] (!%p2151_p6)  ;;  %v1866_v21 = vld [vmem:[%s4006_s29 + $0x10] sm:$0xff] (!%p2151_p6) }
 0x66c   : > { %1880 = vst [vmem:[%s3370_s6] sm:$0xff] (!%p2151_p6), %v1864_v34  ;;  %1881 = vst [vmem:[%s3370_s6 + $0x8] sm:$0xff] (!%p2151_p6), %v1865_v20  ;;  %v1867_v59 = vld [vmem:[%s4006_s29 + $0x18] sm:$0xff] (!%p2151_p6)  ;;  %v1868_v25 = vld [vmem:[%s4006_s29 + $0x20] sm:$0xff] (!%p2151_p6) }
 0x66d   : > { %1882 = vst [vmem:[%s3370_s6 + $0x10] sm:$0xff] (!%p2151_p6), %v1866_v21  ;;  %v1869_v24 = vld [vmem:[%s4006_s29 + $0x28] sm:$0xff] (!%p2151_p6)  ;;  %1883 = vst [vmem:[%s3370_s6 + $0x18] sm:$0xff] (!%p2151_p6), %v1867_v59  ;;  %v1870_v50 = vld [vmem:[%s4006_s29 + $0x30] sm:$0xff] (!%p2151_p6) }
 0x66e   : > { %1884 = vst [vmem:[%s3370_s6 + $0x20] sm:$0xff] (!%p2151_p6), %v1868_v25  ;;  %1885 = vst [vmem:[%s3370_s6 + $0x28] sm:$0xff] (!%p2151_p6), %v1869_v24  ;;  %v1871_v26 = vld [vmem:[%s4006_s29 + $0x38] sm:$0xff] (!%p2151_p6)  ;;  %v1872_v28 = vld [vmem:[%s4006_s29 + $0x40] sm:$0xff] (!%p2151_p6) }
 0x66f   : > { %1886 = vst [vmem:[%s3370_s6 + $0x30] sm:$0xff] (!%p2151_p6), %v1870_v50  ;;  %1887 = vst [vmem:[%s3370_s6 + $0x38] sm:$0xff] (!%p2151_p6), %v1871_v26  ;;  %v1873_v0 = vld [vmem:[%s4006_s29 + $0x48] sm:$0xff] (!%p2151_p6)  ;;  %v1874_v29 = vld [vmem:[%s4006_s29 + $0x50] sm:$0xff] (!%p2151_p6) }
 0x670   : > { %1888 = vst [vmem:[%s3370_s6 + $0x40] sm:$0xff] (!%p2151_p6), %v1872_v28  ;;  %v1875_v3 = vld [vmem:[%s4006_s29 + $0x58] sm:$0xff] (!%p2151_p6)  ;;  %1889 = vst [vmem:[%s3370_s6 + $0x48] sm:$0xff] (!%p2151_p6), %v1873_v0  ;;  %v1876_v32 = vld [vmem:[%s4006_s29 + $0x60] sm:$0xff] (!%p2151_p6) }
 0x671   : > { %1890 = vst [vmem:[%s3370_s6 + $0x50] sm:$0xff] (!%p2151_p6), %v1874_v29  ;;  %1891 = vst [vmem:[%s3370_s6 + $0x58] sm:$0xff] (!%p2151_p6), %v1875_v3  ;;  %v1877_v4 = vld [vmem:[%s4006_s29 + $0x68] sm:$0xff] (!%p2151_p6)  ;;  %v1878_v1 = vld [vmem:[%s4006_s29 + $0x70] sm:$0xff] (!%p2151_p6) }
 0x672   : > { %1892 = vst [vmem:[%s3370_s6 + $0x60] sm:$0xff] %v1876_v32  ;;  %1893 = vst [vmem:[%s3370_s6 + $0x68] sm:$0xff] %v1877_v4  ;;  %v1879_v2 = vld [vmem:[%s4006_s29 + $0x78] sm:$0xff] }
 0x673   : > { %1894 = vst [vmem:[%s3370_s6 + $0x70] sm:$0xff] %v1878_v1  ;;  %1895 = vst [vmem:[%s3370_s6 + $0x78] sm:$0xff] %v1879_v2 }
 0x674 PF: > { %s4213_s30 = sld [smem:[#allocation23_spill]]  ;;  %s4215_s0 = sld [smem:[#allocation26_spill]] }
 0x675   : > { %s4216_s10 = sld [smem:[#allocation36_spill]]  ;;  %s1910_s24 = sshll.u32 %s3370_s6, 4  ;;  %s4047_s24 = int_to_ptr.vmem [resolvable:$true] %s1910_s24 }
 0x676   : > { %s4051_s28 = scalar_lea.sflag [#allocation7], %s454_s4  ;;  %s2802_s9 = scalar_lea.vmem %s4047_s24, 2048 }
 0x677   : > { %p2803_p13 = scmp.ne.s32.totalorder %s4047_s24, %s2802_s9  ;;  %s2971_s15 = smov [#allocation15]  }
 0x678   : > { %s2806_s2 = sshll.u32 %s2971_s15, 4  ;;  %s2807_s2 = int_to_ptr.vmem [resolvable:$false] %s2806_s2 }
 0x679   : > { %s2808_s29 = scalar_lea.vmem %s2807_s2, 4096  ;;  %p2809_p7 = scmp.lt.s32.totalorder %s4047_s24, %s2807_s2 }
 0x67a   : > { %s2160_s27 = sshll.u32 %s4213_s30, 11  ;;  %p4218_p10 = scmp.ne.s32.totalorder %s4215_s0, 0 }
 0x67b   : > { %s4217_s5 = smov %s4216_s10  ;;  %s4044_s12 = scalar_lea.hbm %s4216_s10, %s2160_s27 }
 0x67c   : > { %p2804_p5 = pnand %p2803_p13, %p4218_p10  ;;  %p2810_p1 = scmp.lt.s32.totalorder %s2808_s29, %s2802_s9 }
 0x67e   : > { %p2805_p4 = pneg %p2804_p5  ;;  %p2811_p11 = por %p2810_p1, %p2809_p7 }
 0x680   : > { %p2812_p8 = pnand %p2811_p11, %p2805_p4 }
 0x682   : > { %2815 = shalt.err (!%p2812_p8)
}
 0x683   : > { %s2816_s4 = scalar_lea.hbm %s4044_s12, 2048  ;;  %s2820_s7 = scalar_lea.hbm %s4217_s5, 4096 }
 0x684   : > { %p2817_p3 = scmp.ne.s32.totalorder %s4044_s12, %s2816_s4  ;;  %p2821_p0 = scmp.lt.u32.totalorder %s4044_s12, %s4217_s5 }
 0x685   : > { %p2822_p9 = scmp.lt.u32.totalorder %s2820_s7, %s2816_s4  ;;  %p2824_p13 = scmp.lt.u32.totalorder %s2816_s4, %s4044_s12 }
 0x686   : > { %p2818_p2 = pnand %p2817_p3, %p4218_p10 }
 0x687   : > { %p2823_p6 = por %p2822_p9, %p2821_p0 }
 0x688   : > { %p2819_p12 = pneg %p2818_p2 }
 0x689   : > { %p2825_p5 = por %p2824_p13, %p2823_p6 }
 0x68b   : > { %p2826_p4 = pnand %p2825_p5, %p2819_p12 }
 0x68d   : > { %2829 = shalt.err (!%p2826_p4)
}
 0x68e   : > { %s2972_s25 = smov 128   ;;  %s2973_s10 = smov 8  }
 0x68f   : > { %2433 = dma.vmem_to_hbm [thread:$0]  (%p4218_p10), %s4047_s24, 2048, %s4044_s12, %s4051_s28, %s2972_s25, %s2972_s25, %s2973_s10  }
 0x690 PF: > { %s4219_s9 = sld [smem:[#allocation21_spill]]  ;;  %s4220_s15 = sld [smem:[#allocation27_spill]] }
 0x691   : > { %p2463_p7 = scmp.ge.s32.totalorder %s2960_s22, 2 }
 0x696   : > { %s1925_s2 = sand.u32 1, %s4219_s9   ;;  %p4221_p1 = scmp.ne.s32.totalorder %s4220_s15, 0 }
 0x697   : > { %s1926_s29 = scalar_lea.sflag [#allocation7], %s1925_s2 }
 0x698   : > { %p2453_p11 = pnand %p2463_p7, %p4221_p1 }
 0x69a   : > { %2903 = dma.done.wait (!%p2453_p11), %s1926_s29, 2048  }
 0x69b   : > { %2905 = vsyncadd (!%p2453_p11), %s1926_s29, 4294965248  ;;  %s30_s22 = sadd.s32 1, %s2960_s22   ;;  %s4223_s30 = sld [smem:[#allocation22_spill]] }
 0x69c   : > { %p4080_p8 = scmp.ge.s32.totalorder %s30_s22, 8   ;;  %s4224_s0 = sld [smem:[#allocation28_spill]] }
 0x69d   : > { %s4225_s10 = smov %s2916_s11  ;;  %s4227_s12 = smov %s2924_s13 }
 0x69e   : > { %s4228_s13 = smov %s2928_s14  ;;  %s4229_s14 = smov %s3297_s18 }
 0x69f   : > { %s4230_s15 = smov %s2936_s16  ;;  %s4231_s16 = smov %s2940_s17 }
 0x6a0   : > { %s4232_s17 = smov %s3241_s19  ;;  %s4233_s18 = smov %s2952_s20 }
 0x6a1   : > { %s4234_s19 = smov %s2956_s21  ;;  %s4235_s20 = smov %s4238_s23 }
 0x6a2   : > { %s4226_s11 = smov %s4224_s0  ;;  %s4236_s21 = smov %s4242_s26 }
 0x6a3   :  { %29 = sbr.rel (!%p4080_p8) target bundleno = 23 (0x17), region = 154 }
 0x6aa   :  { %1931 = vsyncpa [#allocation6], 1 }
 0x6ab   :  { %1933 = vsyncpa [#allocation6 + $0x1], 1 }
 0x6ac   :  { %1934 = vsyncpa [#allocation11], 1 }
 0x6ad   :  { %1935 = vsyncpa [#allocation14], 1 }
 0x6ae   :  { %1937 = vsyncpa [#allocation14 + $0x1], 1 }
 0x6af   :  { %1938 = vsyncpa [#allocation7], 1 }
 0x6b0   :  { %1940 = vsyncpa [#allocation7 + $0x1], 1 }
 0x6b1   :  { %1941 = vsyncpa [#allocation8], 1 }
 0x6b2   :  { %1943 = vsyncpa [#allocation8 + $0x1], 1 }

</bundles_post_ra>
